<compile_context>
chip_gen: v7x
topology: tpu7x:2x2x1
jax: 0.10.0
libtpu: 0.0.40
codegen_flags: <defaults>
</compile_context>

<pallas_src>
import jax
import jax.numpy as jnp
from jax.experimental import pallas as pl
from jax.experimental.pallas import tpu as pltpu

LAYER_SIZES = (2, 10, 20, 10, 5, 2)
N_LAYERS = len(LAYER_SIZES) - 1   # 5
PAD = 128                         # lane-padded feature width for hidden layers
PROWS = PAD + 8                   # 136 rows: 0:128 weight, 128 bias, 129:136 zero pad
BLOCK_B = 256                     # batch tile (full 256-row MXU push on v6e/v7x)


def guide_mlp_kernel(v_ref, p_ref, out_ref):
    """Full Guide MLP + (mean, std) head for one batch tile.

    v_ref:   [bb, 2]          tight input (features x1, x2)
    p_ref:   [5, 136, 128]    packed zero-padded weights (rows 0:128) + bias (row 128)
    out_ref: [bb, 2]          lane 0 = mean, lane 1 = std
    """
    x = v_ref[...]                                        # [bb, 2] f32
    # Layer 0 (in-features = 2): lane-broadcast multiplies on the VPU instead of
    # padding the input to 128 lanes.  Padded output lanes stay exactly 0
    # through bias + ReLU because the packed weights/biases are zero-padded.
    h = (x[:, 0:1] * p_ref[0, 0:1, :]
         + x[:, 1:2] * p_ref[0, 1:2, :]
         + p_ref[0, PAD:PAD + 1, :])                      # [bb, 128]
    h = jnp.maximum(h, 0.0)
    # Layers 1..4: uniform zero-padded [bb,128] @ [128,128] MXU matmuls.
    for i in range(1, N_LAYERS):                          # static unroll
        w = p_ref[i, 0:PAD, :]                            # [128, 128] view
        b = p_ref[i, PAD:PAD + 1, :]                      # [1, 128]   view
        h = jnp.dot(h, w, preferred_element_type=jnp.float32) + b
        if i < N_LAYERS - 1:
            h = jnp.maximum(h, 0.0)
    # Epilogue: take lanes 0:2, exp on lane 1 (std), identity on lane 0 (mean).
    out2 = h[:, 0:2]                                      # [bb, 2]
    lane = jax.lax.broadcasted_iota(jnp.int32, out2.shape, 1)
    out_ref[...] = jnp.where(lane == 1, jnp.exp(out2), out2)


def init_params(key):
    """nn.Linear-like init; weights stored (in, out) so the kernel does x @ W + b."""
    params = []
    for i in range(N_LAYERS):
        fan_in, fan_out = LAYER_SIZES[i], LAYER_SIZES[i + 1]
        key, wk, bk = jax.random.split(key, 3)
        bound = 1.0 / (fan_in ** 0.5)
        w = jax.random.uniform(wk, (fan_in, fan_out), jnp.float32, -bound, bound)
        b = jax.random.uniform(bk, (fan_out,), jnp.float32, -bound, bound)
        params.append((w, b))
    return params


def pack_params(params):
    """Pack all weights/biases into one zero-padded (5, 136, 128) f32 buffer."""
    buf = jnp.zeros((N_LAYERS, PROWS, PAD), jnp.float32)
    for i, (w, b) in enumerate(params):
        fin, fout = w.shape
        buf = buf.at[i, :fin, :fout].set(w)
        buf = buf.at[i, PAD, :fout].set(b)
    return buf


@jax.jit
def guide_forward_batched(obs, packed_params):
    """Batched Guide MLP.  obs: [B, 2] float32 -> (mean [B], std [B])."""
    B = obs.shape[0]
    # Adaptive batch tile: 256 for real batches, 8-row granularity for tiny ones.
    bb = BLOCK_B if B >= BLOCK_B else ((B + 7) // 8) * 8
    Bp = ((B + bb - 1) // bb) * bb
    v = obs.astype(jnp.float32)
    if Bp != B:
        v = jnp.pad(v, ((0, Bp - B), (0, 0)))

    out = pl.pallas_call(
        guide_mlp_kernel,
        out_shape=jax.ShapeDtypeStruct((Bp, 2), jnp.float32),
        grid=(Bp // bb,),
        in_specs=[
            pl.BlockSpec((bb, 2), lambda i: (i, 0)),
            pl.BlockSpec((N_LAYERS, PROWS, PAD), lambda i: (0, 0, 0)),
        ],
        out_specs=pl.BlockSpec((bb, 2), lambda i: (i, 0)),
        compiler_params=pltpu.CompilerParams(
            dimension_semantics=("parallel",)),
    )(v, packed_params)

    return out[:B, 0], out[:B, 1]


def guide_forward(prior_mean, observations, packed_params):
    """Signature-parity wrapper matching the PyTorch Guide.forward (batch=1)."""
    del prior_mean  # unused by the original forward's neural net
    x1 = jnp.asarray(observations['x1'], jnp.float32).reshape(())
    x2 = jnp.asarray(observations['x2'], jnp.float32).reshape(())
    obs = jnp.stack([x1, x2])[None, :]              # [1, 2]
    mean, std = guide_forward_batched(obs, packed_params)
    # TODO(synk): pyro.module('guide', ...) and pyro.sample('z', Normal(mean, std))
    # are effectful/stochastic ops with no Pallas equivalent; we return the
    # Normal parameters instead.
    return mean[0], std[0]


if __name__ == "__main__":
    key = jax.random.PRNGKey(0)
    pkey, okey = jax.random.split(key)

    params = init_params(pkey)
    packed = pack_params(params)

    B = 512   # two 256-row grid steps; still a tiny amount of data
    obs = jax.random.normal(okey, (B, 2), jnp.float32)

    # Batched path (fills sublanes / MXU tiles, 2 grid steps).
    mean_b, std_b = guide_forward_batched(obs, packed)
    jax.block_until_ready((mean_b, std_b))

    # Original-module-style scalar path (batch 1 -> 8-row block).
    m0, s0 = guide_forward(jnp.float32(0.0),
                           {'x1': obs[0, 0], 'x2': obs[0, 1]}, packed)
    jax.block_until_ready((m0, s0))

    # Pure-JAX reference of the same math (unpacked params).
    h = obs
    for i, (w, b) in enumerate(params):
        h = h @ w + b
        if i < N_LAYERS - 1:
            h = jnp.maximum(h, 0.0)
    ref_mean, ref_std = h[:, 0], jnp.exp(h[:, 1])

    assert jnp.allclose(mean_b, ref_mean, atol=1e-4, rtol=1e-4)
    assert jnp.allclose(std_b, ref_std, atol=1e-4, rtol=1e-4)
    assert jnp.allclose(m0, ref_mean[0], atol=1e-4, rtol=1e-4)
    assert jnp.allclose(s0, ref_std[0], atol=1e-4, rtol=1e-4)
    print("KERNEL_OK")
</pallas_src>

<mosaic_0001>
module attributes {stable_mosaic.version = 11 : i64} {
  func.func @guide_mlp_kernel(%arg0: i32, %arg1: memref<256x2xf32, #tpu.memory_space<vmem>>, %arg2: memref<5x136x128xf32, #tpu.memory_space<vmem>>, %arg3: memref<256x2xf32, #tpu.memory_space<vmem>>) attributes {dimension_semantics = [#tpu.dimension_semantics<parallel>], iteration_bounds = array<i64: 2>, scalar_prefetch = 0 : i64, scratch_operands = 0 : i64, tpu.core_type = #tpu.core_type<tc>, window_params = [{transform_indices = @transform_0, window_bounds = array<i64: 256, 2>}, {pipeline_mode = #tpu.pipeline_mode<synchronous>, transform_indices = @transform_1, window_bounds = array<i64: 5, 136, 128>}, {transform_indices = @transform_2, window_bounds = array<i64: 256, 2>}]} {
    %c0 = arith.constant 0 : index
    %c0_0 = arith.constant 0 : index
    %0 = vector.load %arg1[%c0, %c0_0] : memref<256x2xf32, #tpu.memory_space<vmem>>, vector<256x2xf32>
    %1 = vector.extract_strided_slice %0 {offsets = [0, 0], sizes = [256, 1], strides = [1, 1]} : vector<256x2xf32> to vector<256x1xf32>
    %c0_1 = arith.constant 0 : index
    %c0_2 = arith.constant 0 : index
    %c0_3 = arith.constant 0 : index
    %2 = vector.load %arg2[%c0_1, %c0_2, %c0_3] : memref<5x136x128xf32, #tpu.memory_space<vmem>>, vector<1x1x128xf32>
    %3 = vector.shape_cast %2 : vector<1x1x128xf32> to vector<1x128xf32>
    %4 = vector.broadcast %1 : vector<256x1xf32> to vector<256x128xf32>
    %5 = vector.broadcast %3 : vector<1x128xf32> to vector<256x128xf32>
    %6 = arith.mulf %4, %5 : vector<256x128xf32>
    %7 = vector.extract_strided_slice %0 {offsets = [0, 1], sizes = [256, 1], strides = [1, 1]} : vector<256x2xf32> to vector<256x1xf32>
    %c0_4 = arith.constant 0 : index
    %c1 = arith.constant 1 : index
    %c0_5 = arith.constant 0 : index
    %8 = vector.load %arg2[%c0_4, %c1, %c0_5] : memref<5x136x128xf32, #tpu.memory_space<vmem>>, vector<1x1x128xf32>
    %9 = vector.shape_cast %8 : vector<1x1x128xf32> to vector<1x128xf32>
    %10 = vector.broadcast %7 : vector<256x1xf32> to vector<256x128xf32>
    %11 = vector.broadcast %9 : vector<1x128xf32> to vector<256x128xf32>
    %12 = arith.mulf %10, %11 : vector<256x128xf32>
    %13 = arith.addf %6, %12 : vector<256x128xf32>
    %c0_6 = arith.constant 0 : index
    %c128 = arith.constant 128 : index
    %c0_7 = arith.constant 0 : index
    %14 = vector.load %arg2[%c0_6, %c128, %c0_7] : memref<5x136x128xf32, #tpu.memory_space<vmem>>, vector<1x1x128xf32>
    %15 = vector.shape_cast %14 : vector<1x1x128xf32> to vector<1x128xf32>
    %16 = vector.broadcast %15 : vector<1x128xf32> to vector<256x128xf32>
    %17 = arith.addf %13, %16 : vector<256x128xf32>
    %cst = arith.constant 0.000000e+00 : f32
    %18 = vector.broadcast %cst : f32 to vector<256x128xf32>
    %19 = arith.maximumf %17, %18 : vector<256x128xf32>
    %c1_8 = arith.constant 1 : index
    %c0_9 = arith.constant 0 : index
    %c0_10 = arith.constant 0 : index
    %20 = vector.load %arg2[%c1_8, %c0_9, %c0_10] : memref<5x136x128xf32, #tpu.memory_space<vmem>>, vector<1x128x128xf32>
    %21 = vector.shape_cast %20 : vector<1x128x128xf32> to vector<128x128xf32>
    %c1_11 = arith.constant 1 : index
    %c128_12 = arith.constant 128 : index
    %c0_13 = arith.constant 0 : index
    %22 = vector.load %arg2[%c1_11, %c128_12, %c0_13] : memref<5x136x128xf32, #tpu.memory_space<vmem>>, vector<1x1x128xf32>
    %23 = vector.shape_cast %22 : vector<1x1x128xf32> to vector<1x128xf32>
    %cst_14 = arith.constant dense<0.000000e+00> : vector<256x128xf32>
    %24 = tpu.matmul %19, %21, %cst_14 {dimension_numbers = #tpu.dot_dimension_numbers<[1], [0], [0], [1], [0, 0, 1, 1], [], []>} : vector<256x128xf32>, vector<128x128xf32>, vector<256x128xf32> -> vector<256x128xf32>
    %25 = vector.broadcast %23 : vector<1x128xf32> to vector<256x128xf32>
    %26 = arith.addf %24, %25 : vector<256x128xf32>
    %cst_15 = arith.constant 0.000000e+00 : f32
    %27 = vector.broadcast %cst_15 : f32 to vector<256x128xf32>
    %28 = arith.maximumf %26, %27 : vector<256x128xf32>
    %c2 = arith.constant 2 : index
    %c0_16 = arith.constant 0 : index
    %c0_17 = arith.constant 0 : index
    %29 = vector.load %arg2[%c2, %c0_16, %c0_17] : memref<5x136x128xf32, #tpu.memory_space<vmem>>, vector<1x128x128xf32>
    %30 = vector.shape_cast %29 : vector<1x128x128xf32> to vector<128x128xf32>
    %c2_18 = arith.constant 2 : index
    %c128_19 = arith.constant 128 : index
    %c0_20 = arith.constant 0 : index
    %31 = vector.load %arg2[%c2_18, %c128_19, %c0_20] : memref<5x136x128xf32, #tpu.memory_space<vmem>>, vector<1x1x128xf32>
    %32 = vector.shape_cast %31 : vector<1x1x128xf32> to vector<1x128xf32>
    %cst_21 = arith.constant dense<0.000000e+00> : vector<256x128xf32>
    %33 = tpu.matmul %28, %30, %cst_21 {dimension_numbers = #tpu.dot_dimension_numbers<[1], [0], [0], [1], [0, 0, 1, 1], [], []>} : vector<256x128xf32>, vector<128x128xf32>, vector<256x128xf32> -> vector<256x128xf32>
    %34 = vector.broadcast %32 : vector<1x128xf32> to vector<256x128xf32>
    %35 = arith.addf %33, %34 : vector<256x128xf32>
    %cst_22 = arith.constant 0.000000e+00 : f32
    %36 = vector.broadcast %cst_22 : f32 to vector<256x128xf32>
    %37 = arith.maximumf %35, %36 : vector<256x128xf32>
    %c3 = arith.constant 3 : index
    %c0_23 = arith.constant 0 : index
    %c0_24 = arith.constant 0 : index
    %38 = vector.load %arg2[%c3, %c0_23, %c0_24] : memref<5x136x128xf32, #tpu.memory_space<vmem>>, vector<1x128x128xf32>
    %39 = vector.shape_cast %38 : vector<1x128x128xf32> to vector<128x128xf32>
    %c3_25 = arith.constant 3 : index
    %c128_26 = arith.constant 128 : index
    %c0_27 = arith.constant 0 : index
    %40 = vector.load %arg2[%c3_25, %c128_26, %c0_27] : memref<5x136x128xf32, #tpu.memory_space<vmem>>, vector<1x1x128xf32>
    %41 = vector.shape_cast %40 : vector<1x1x128xf32> to vector<1x128xf32>
    %cst_28 = arith.constant dense<0.000000e+00> : vector<256x128xf32>
    %42 = tpu.matmul %37, %39, %cst_28 {dimension_numbers = #tpu.dot_dimension_numbers<[1], [0], [0], [1], [0, 0, 1, 1], [], []>} : vector<256x128xf32>, vector<128x128xf32>, vector<256x128xf32> -> vector<256x128xf32>
    %43 = vector.broadcast %41 : vector<1x128xf32> to vector<256x128xf32>
    %44 = arith.addf %42, %43 : vector<256x128xf32>
    %cst_29 = arith.constant 0.000000e+00 : f32
    %45 = vector.broadcast %cst_29 : f32 to vector<256x128xf32>
    %46 = arith.maximumf %44, %45 : vector<256x128xf32>
    %c4 = arith.constant 4 : index
    %c0_30 = arith.constant 0 : index
    %c0_31 = arith.constant 0 : index
    %47 = vector.load %arg2[%c4, %c0_30, %c0_31] : memref<5x136x128xf32, #tpu.memory_space<vmem>>, vector<1x128x128xf32>
    %48 = vector.shape_cast %47 : vector<1x128x128xf32> to vector<128x128xf32>
    %c4_32 = arith.constant 4 : index
    %c128_33 = arith.constant 128 : index
    %c0_34 = arith.constant 0 : index
    %49 = vector.load %arg2[%c4_32, %c128_33, %c0_34] : memref<5x136x128xf32, #tpu.memory_space<vmem>>, vector<1x1x128xf32>
    %50 = vector.shape_cast %49 : vector<1x1x128xf32> to vector<1x128xf32>
    %cst_35 = arith.constant dense<0.000000e+00> : vector<256x128xf32>
    %51 = tpu.matmul %46, %48, %cst_35 {dimension_numbers = #tpu.dot_dimension_numbers<[1], [0], [0], [1], [0, 0, 1, 1], [], []>} : vector<256x128xf32>, vector<128x128xf32>, vector<256x128xf32> -> vector<256x128xf32>
    %52 = vector.broadcast %50 : vector<1x128xf32> to vector<256x128xf32>
    %53 = arith.addf %51, %52 : vector<256x128xf32>
    %54 = vector.extract_strided_slice %53 {offsets = [0, 0], sizes = [256, 2], strides = [1, 1]} : vector<256x128xf32> to vector<256x2xf32>
    %55 = tpu.iota {dimensions = array<i32: 1>} : vector<256x2xi32>
    %c1_i32 = arith.constant 1 : i32
    %56 = vector.broadcast %c1_i32 : i32 to vector<256x2xi32>
    %57 = arith.cmpi eq, %55, %56 : vector<256x2xi32>
    %58 = math.exp %54 : vector<256x2xf32>
    %59 = arith.select %57, %58, %54 : vector<256x2xi1>, vector<256x2xf32>
    %c0_36 = arith.constant 0 : index
    %c0_37 = arith.constant 0 : index
    %60 = vector.load %arg3[%c0_36, %c0_37] : memref<256x2xf32, #tpu.memory_space<vmem>>, vector<256x2xf32>
    tpu.vector_store %arg3[%c0_36, %c0_37], %59 {strides = array<i32>} : memref<256x2xf32, #tpu.memory_space<vmem>>, vector<256x2xf32>,
    return
  }
  func.func @transform_0(%arg0: i32) -> (i32, i32) {
    %c0_i32 = arith.constant 0 : i32
    %c0_i32_0 = arith.constant 0 : i32
    return %arg0, %c0_i32 : i32, i32
  }
  func.func @transform_1(%arg0: i32) -> (i32, i32, i32) {
    %c0_i32 = arith.constant 0 : i32
    %c0_i32_0 = arith.constant 0 : i32
    %c0_i32_1 = arith.constant 0 : i32
    %c0_i32_2 = arith.constant 0 : i32
    return %c0_i32, %c0_i32_0, %c0_i32_1 : i32, i32, i32
  }
  func.func @transform_2(%arg0: i32) -> (i32, i32) {
    %c0_i32 = arith.constant 0 : i32
    %c0_i32_0 = arith.constant 0 : i32
    return %arg0, %c0_i32 : i32, i32
  }
}

</mosaic_0001>

<bundles_post_ra>
// kernel: guide_forward_batched.1
= control target key start
LH: loop header
LB: loop body
LE: loop exit
PB: predicated region body
PF: predicated region fallthrough
CT: control target
= control target key end

     0   :  { %7 = vsyncpa [#allocation3], 0  ;;  %s2753_s9 = smov 0   ;;  %s3224_s0 = inlined_call_operand.vmem [shape: f32[512,2], index: 0, kind: input, shape index: {}]   ;;  %s3225_s1 = inlined_call_operand.hbm [shape: f32[5,136,128], index: 1, kind: input, shape index: {}]   ;;  %s3226_s2 = inlined_call_operand.vmem [shape: f32[512,2], index: 2, kind: output, shape index: {}]  }
   0x1 LB: > { %s1941_s10 = sadd.s32 4294967295, %s2731_s9   ;;  %p1943_p0 = scmp.ge.s32.totalorder %s2731_s9, 1  ;;  %s2731_s9 = sphi %s2753_s9, %s13_s9  }
   0x2   : > { %p91_p1 = scmp.lt.s32.totalorder %s2731_s9, 3  ;;  %s2733_s11 = smov [#allocation2]  }
   0x3   : > { %s103_s12 = sshll.u32 %s2733_s11, 4  ;;  %p2767_p3 = scmp.eq.s32.totalorder %s1941_s10, 0  ;;  %s104_s12 = int_to_ptr.vmem [resolvable:$true] %s103_s12 }
   0x4   : > { %p2761_p2 = pnand %p1943_p0, %p91_p1  ;;  %s2693_s18 = scalar_lea.hbm %s3225_s1, 10880 }
   0x5   : > { %s3231_s14 = scalar_select %p2767_p3, 1, 0 }
   0x6   : > { %s3230_s13 = scalar_select %p2761_p2, 1, 0 }
   0x7   : > { %p2605_p4 = pneg %p2761_p2  ;;  %p2694_p6 = scmp.ne.s32.totalorder %s3225_s1, %s2693_s18 }
   0x8   : > { %p2700_p10 = scmp.lt.u32.totalorder %s2693_s18, %s3225_s1 }
   0x9   : > { %p2775_p5 = pnand %p2767_p3, %p2605_p4 }
   0xb   : > { %p2695_p7 = pneg %p2775_p5 }
   0xd   : > { %p2696_p8 = pnand %p2695_p7, %p2694_p6 }
   0xf   : > { %p2697_p9 = pneg %p2696_p8 }
  0x11   : > { %p2702_p11 = pnand %p2700_p10, %p2697_p9 }
  0x13   : > { %2705 = shalt.err (!%p2702_p11)
}
  0x14   : > { %s2706_s23 = scalar_lea.vmem %s104_s12, 10880  ;;  %p2714_p1 = scmp.lt.s32.totalorder %s104_s12, %s104_s12 }
  0x15   : > { %p2707_p12 = scmp.ne.s32.totalorder %s104_s12, %s2706_s23  ;;  %p2715_p4 = scmp.lt.s32.totalorder %s2706_s23, %s2706_s23 }
  0x17   : > { %p2709_p13 = pnand %p2707_p12, %p2695_p7  ;;  %p2716_p3 = por %p2715_p4, %p2714_p1 }
  0x19   : > { %p2710_p0 = pneg %p2709_p13 }
  0x1b   : > { %p2717_p2 = pnand %p2716_p3, %p2710_p0 }
  0x1d   : > { %2720 = shalt.err (!%p2717_p2)
}
  0x1e   : > { %s2734_s24 = smov 128   ;;  %s2735_s25 = smov 8  }
  0x1f   : > { %2608 = dma.hbm_to_vmem [thread:$0]  (!%p2775_p5), %s3225_s1, 10880, %s104_s12, [#allocation3], %s2734_s24, %s2734_s24, %s2735_s25  }
  0x20   : > { %p3233_p6 = scmp.ne.s32.totalorder %s3230_s13, 0 }
  0x21   : > { %p3234_p8 = scmp.ne.s32.totalorder (!%p3233_p6), %s3231_s14, 0 }
  0x22   : > { %128 = sbr.rel (%p3233_p6) target bundleno = 1195 (0x4ab), region = 28 }
  0x29   : > { %2726 = dma.done.wait (%p3234_p8), [#allocation3], 10880  }
  0x2a   : > { %2728 = vsyncadd (%p3234_p8), [#allocation3], 4294956416  ;;  %s1948_s28 = sshll.u32 %s1941_s10, 5  ;;  %v2736_v0 = vmov 0   ;;  %v2737_v3 = vmov 1   ;;  %v658_v5 = vld [vmem:[#allocation2 + $0x88] sm:$0xff] }
  0x2b   : > { %2626 = vset.pattern.permute.xlu1 %v2736_v0  ;;  %2624 = vset.pattern.permute.xlu0 %v2736_v0  ;;  %p151_p2 = scmp.lt.s32.totalorder %s1948_s28, 63  ;;  %v659_v6 = vld [vmem:[#allocation2 + $0x90] sm:$0xff]  ;;  %v660_v8 = vld [vmem:[#allocation2 + $0x98] sm:$0xff]  ;;  %v661_v9 = vld [vmem:[#allocation2 + $0xa0] sm:$0xff]  ;;  %vm1840_vm1 = vcmask 15360  }
  0x2c   : > { %v2473_v7 = vpack.c.bf16 %v659_v6, %v658_v5  ;;  %v2477_v11 = vpack.c.bf16 %v661_v9, %v660_v8  ;;  %v662_v12 = vld [vmem:[#allocation2 + $0xa8] sm:$0xff]  ;;  %v663_v13 = vld [vmem:[#allocation2 + $0xb0] sm:$0xff]  ;;  %v664_v16 = vld [vmem:[#allocation2 + $0xb8] sm:$0xff] }
  0x2d   : > { %s3236_s28 = smov (!%p151_p2, %s1948_s28), 63  ;;  %v2481_v14 = vpack.c.bf16 %v663_v13, %v662_v12  ;;  %v665_v17 = vld [vmem:[#allocation2 + $0xc0] sm:$0xff]  ;;  %v666_v20 = vld [vmem:[#allocation2 + $0xc8] sm:$0xff]  ;;  %v667_v21 = vld [vmem:[#allocation2 + $0xd0] sm:$0xff] }
  0x2e   : > { %s1949_s29 = sshll.u32 %s3236_s28, 3  ;;  %2474 = vmatprep.subr.bf16.mxu0 %v2473_v7  ;;  %v2485_v18 = vpack.c.bf16 %v665_v17, %v664_v16  ;;  %v2489_v22 = vpack.c.bf16 %v667_v21, %v666_v20  ;;  %v668_v24 = vld [vmem:[#allocation2 + $0xd8] sm:$0xff]  ;;  %v669_v25 = vld [vmem:[#allocation2 + $0xe0] sm:$0xff]  ;;  %v670_v28 = vld [vmem:[#allocation2 + $0xe8] sm:$0xff] }
  0x2f   : > { %s2811_s4 = scalar_lea.vmem %s3224_s0, %s1949_s29  ;;  %2476 = vmatpush3.bf16.msra.mxu0 %v2473_v7  ;;  %v2493_v26 = vpack.c.bf16 %v669_v25, %v668_v24  ;;  %v671_v29 = vld [vmem:[#allocation2 + $0xf0] sm:$0xff]  ;;  %v672_v32 = vld [vmem:[#allocation2 + $0xf8] sm:$0xff]  ;;  %v673_v33 = vld [vmem:[#allocation2 + $0x100] sm:$0xff]  ;;  %s3063_s7 = scalar_lea.vmem %s3226_s2, %s1949_s29 }
  0x30   : > { %v163_v1 = vld [vmem:[%s2811_s4 + $0x8] sm:$0xff]  ;;  %v162_v2 = vld [vmem:[%s2811_s4] sm:$0xff]  ;;  %v164_v4 = vld [vmem:[%s2811_s4 + $0x10] sm:$0xff]  ;;  %2478 = vmatprep.subr.bf16.mxu0 %v2477_v11  ;;  %v2497_v30 = vpack.c.bf16 %v671_v29, %v670_v28  ;;  %v2501_v34 = vpack.c.bf16 %v673_v33, %v672_v32 }
  0x31   : > { %202 = vperm.xlu1 %2626, %v163_v1   ;;  %197 = vperm.xlu0 %2624, %v162_v2   ;;  %v165_v10 = vld [vmem:[%s2811_s4 + $0x18] sm:$0xff]  ;;  %v166_v15 = vld [vmem:[%s2811_s4 + $0x20] sm:$0xff]  ;;  %v167_v19 = vld [vmem:[%s2811_s4 + $0x28] sm:$0xff] }
  0x32   : > { %v168_v23 = vld [vmem:[%s2811_s4 + $0x30] sm:$0xff]  ;;  %v169_v27 = vld [vmem:[%s2811_s4 + $0x38] sm:$0xff]  ;;  %v170_v31 = vld [vmem:[%s2811_s4 + $0x40] sm:$0xff] }
  0x33   : > { %2480 = vmatpush3.bf16.msra.mxu0 %v2477_v11  ;;  %v171_v35 = vld [vmem:[%s2811_s4 + $0x48] sm:$0xff]  ;;  %v172_v36 = vld [vmem:[%s2811_s4 + $0x50] sm:$0xff]  ;;  %v173_v37 = vld [vmem:[%s2811_s4 + $0x58] sm:$0xff] }
  0x34   : > { %2482 = vmatprep.subr.bf16.mxu0 %v2481_v14  ;;  %v174_v38 = vld [vmem:[%s2811_s4 + $0x60] sm:$0xff]  ;;  %v175_v39 = vld [vmem:[%s2811_s4 + $0x68] sm:$0xff]  ;;  %v176_v40 = vld [vmem:[%s2811_s4 + $0x70] sm:$0xff] }
  0x35   : > { %2627 = vset.pattern.permute.xlu1 %v2737_v3  ;;  %2625 = vset.pattern.permute.xlu0 %v2737_v3  ;;  %v177_v41 = vld [vmem:[%s2811_s4 + $0x78] sm:$0xff]  ;;  %v178_v42 = vld [vmem:[%s2811_s4 + $0x80] sm:$0xff]  ;;  %v179_v43 = vld [vmem:[%s2811_s4 + $0x88] sm:$0xff] }
  0x36   : > { %397 = vperm.xlu1 %2627, %v163_v1   ;;  %393 = vperm.xlu0 %2625, %v162_v2   ;;  %v180_v44 = vld [vmem:[%s2811_s4 + $0x90] sm:$0xff]  ;;  %v181_v45 = vld [vmem:[%s2811_s4 + $0x98] sm:$0xff]  ;;  %v182_v46 = vld [vmem:[%s2811_s4 + $0xa0] sm:$0xff] }
  0x37   : > { %2484 = vmatpush3.bf16.msra.mxu0 %v2481_v14  ;;  %v183_v47 = vld [vmem:[%s2811_s4 + $0xa8] sm:$0xff]  ;;  %v184_v48 = vld [vmem:[%s2811_s4 + $0xb0] sm:$0xff]  ;;  %v185_v49 = vld [vmem:[%s2811_s4 + $0xb8] sm:$0xff] }
  0x38   : > { %2486 = vmatprep.subr.bf16.mxu0 %v2485_v18  ;;  %v186_v50 = vld [vmem:[%s2811_s4 + $0xc0] sm:$0xff]  ;;  %v187_v51 = vld [vmem:[%s2811_s4 + $0xc8] sm:$0xff]  ;;  %v188_v52 = vld [vmem:[%s2811_s4 + $0xd0] sm:$0xff] }
  0x39   : > { %v189_v53 = vld [vmem:[%s2811_s4 + $0xd8] sm:$0xff]  ;;  %v190_v54 = vld [vmem:[%s2811_s4 + $0xe0] sm:$0xff]  ;;  %v191_v55 = vld [vmem:[%s2811_s4 + $0xe8] sm:$0xff] }
  0x3a   : > { %2628 = vset.pattern.permute.xlu1 %v2736_v0  ;;  %401 = vperm.xlu0 %2625, %v164_v4   ;;  %v192_v56 = vld [vmem:[%s2811_s4 + $0xf0] sm:$0xff]  ;;  %v193_v57 = vld [vmem:[%s2811_s4 + $0xf8] sm:$0xff]  ;;  %v2845_v60 = vld [vmem:[#allocation2] ss:$0 sm:$0xff] }
  0x3b   : > { %207 = vperm.xlu1 %2628, %v164_v4   ;;  %2488 = vmatpush3.bf16.msra.mxu0 %v2485_v18  ;;  %v2847_v61 = vld [vmem:[#allocation2 + $0x1] ss:$0 sm:$0xff]  ;;  %v2853_v4 = vld [vmem:[#allocation2 + $0x80] ss:$0 sm:$0xff]  ;;  %v937_v5 = vld [vmem:[#allocation2 + $0x110] sm:$0xff] }
  0x3c   : > { %2490 = vmatprep.subr.bf16.mxu0 %v2489_v22  ;;  %v938_v6 = vld [vmem:[#allocation2 + $0x118] sm:$0xff]  ;;  %v939_v7 = vld [vmem:[#allocation2 + $0x120] sm:$0xff]  ;;  %v940_v11 = vld [vmem:[#allocation2 + $0x128] sm:$0xff] }
  0x3d   : > { %v2509_v13 = vpack.c.bf16 %v940_v11, %v939_v7  ;;  %v941_v14 = vld [vmem:[#allocation2 + $0x130] sm:$0xff] }
  0x3e   : > { %405 = vperm.xlu0 %2625, %v165_v10  }
  0x3f   : > { %212 = vperm.xlu1 %2628, %v165_v10   ;;  %2492 = vmatpush3.bf16.msra.mxu0 %v2489_v22  ;;  %v2505_v10 = vpack.c.bf16 %v938_v6, %v937_v5 }
  0x40   : > { %2494 = vmatprep.subr.bf16.mxu0 %v2493_v26 }
  0x41   : > { %2506 = vmatprep.subr.bf16.mxu1 %v2505_v10 }
  0x42   : > { %409 = vperm.xlu0 %2625, %v166_v15   ;;  %2508 = vmatpush3.bf16.msra.mxu1 %v2505_v10 }
  0x43   : > { %217 = vperm.xlu1 %2628, %v166_v15   ;;  %2496 = vmatpush3.bf16.msra.mxu0 %v2493_v26  ;;  %v942_v15 = vld [vmem:[#allocation2 + $0x138] sm:$0xff]  ;;  %v943_v26 = vld [vmem:[#allocation2 + $0x140] sm:$0xff] }
  0x44   : > { %2498 = vmatprep.subr.bf16.mxu0 %v2497_v30  ;;  %2510 = vmatprep.subr.bf16.mxu1 %v2509_v13 }
  0x46   : > { %413 = vperm.xlu0 %2625, %v167_v19   ;;  %2512 = vmatpush3.bf16.msra.mxu1 %v2509_v13 }
  0x47   : > { %222 = vperm.xlu1 %2628, %v167_v19   ;;  %2500 = vmatpush3.bf16.msra.mxu0 %v2497_v30 }
  0x48   : > { %2502 = vmatprep.subr.bf16.mxu0 %v2501_v34 }
  0x4a   : > { %417 = vperm.xlu0 %2625, %v168_v23  }
  0x4b   : > { %227 = vperm.xlu1 %2628, %v168_v23   ;;  %2504 = vmatpush3.bf16.msra.mxu0 %v2501_v34  ;;  %v2513_v23 = vpack.c.bf16 %v942_v15, %v941_v14 }
  0x4d   : > { %2514 = vmatprep.subr.bf16.mxu1 %v2513_v23 }
  0x4e   : > { %421 = vperm.xlu0 %2625, %v169_v27   ;;  %2516 = vmatpush3.bf16.msra.mxu1 %v2513_v23 }
  0x4f   : > { %232 = vperm.xlu1 %2628, %v169_v27   ;;  %v944_v27 = vld [vmem:[#allocation2 + $0x148] sm:$0xff] }
  0x50   : > { %v2517_v32 = vpack.c.bf16 %v944_v27, %v943_v26 }
  0x52   : > { %425 = vperm.xlu0 %2625, %v170_v31   ;;  %2518 = vmatprep.subr.bf16.mxu1 %v2517_v32 }
  0x53   : > { %237 = vperm.xlu1 %2628, %v170_v31   ;;  %2520 = vmatpush3.bf16.msra.mxu1 %v2517_v32 }
  0x56   : > { %429 = vperm.xlu0 %2625, %v171_v35  }
  0x57   : > { %242 = vperm.xlu1 %2628, %v171_v35  }
  0x5a   : > { %433 = vperm.xlu0 %2625, %v172_v36  }
  0x5b   : > { %247 = vperm.xlu1 %2628, %v172_v36   ;;  %v945_v36 = vld [vmem:[#allocation2 + $0x150] sm:$0xff] }
  0x5e   : > { %437 = vperm.xlu0 %2625, %v173_v37  }
  0x5f   : > { %252 = vperm.xlu1 %2628, %v173_v37   ;;  %v946_v37 = vld [vmem:[#allocation2 + $0x158] sm:$0xff] }
  0x62   : > { %441 = vperm.xlu0 %2625, %v174_v38  }
  0x63   : > { %257 = vperm.xlu1 %2628, %v174_v38  }
  0x66   : > { %445 = vperm.xlu0 %2625, %v175_v39  }
  0x67   : > { %262 = vperm.xlu1 %2628, %v175_v39  }
  0x6a   : > { %449 = vperm.xlu0 %2625, %v176_v40  }
  0x6b   : > { %267 = vperm.xlu1 %2628, %v176_v40  }
  0x6e   : > { %453 = vperm.xlu0 %2625, %v177_v41  }
  0x6f   : > { %272 = vperm.xlu1 %2628, %v177_v41  }
  0x72   : > { %457 = vperm.xlu0 %2625, %v178_v42  }
  0x73   : > { %277 = vperm.xlu1 %2628, %v178_v42   ;;  %v2521_v42 = vpack.c.bf16 %v946_v37, %v945_v36 }
  0x75   : > { %2522 = vmatprep.subr.bf16.mxu1 %v2521_v42 }
  0x76   : > { %461 = vperm.xlu0 %2625, %v179_v43   ;;  %2524 = vmatpush3.bf16.msra.mxu1 %v2521_v42 }
  0x77   : > { %282 = vperm.xlu1 %2628, %v179_v43  }
  0x7a   : > { %465 = vperm.xlu0 %2625, %v180_v44  }
  0x7b   : > { %287 = vperm.xlu1 %2628, %v180_v44  }
  0x7e   : > { %469 = vperm.xlu0 %2625, %v181_v45  }
  0x7f   : > { %292 = vperm.xlu1 %2628, %v181_v45  }
  0x82   : > { %473 = vperm.xlu0 %2625, %v182_v46  }
  0x83   : > { %297 = vperm.xlu1 %2628, %v182_v46   ;;  %v947_v46 = vld [vmem:[#allocation2 + $0x160] sm:$0xff] }
  0x86   : > { %477 = vperm.xlu0 %2625, %v183_v47  }
  0x87   : > { %302 = vperm.xlu1 %2628, %v183_v47   ;;  %v948_v47 = vld [vmem:[#allocation2 + $0x168] sm:$0xff] }
  0x8a   : > { %481 = vperm.xlu0 %2625, %v184_v48  }
  0x8b   : > { %307 = vperm.xlu1 %2628, %v184_v48  }
  0x8e   : > { %485 = vperm.xlu0 %2625, %v185_v49  }
  0x8f   : > { %312 = vperm.xlu1 %2628, %v185_v49  }
  0x92   : > { %489 = vperm.xlu0 %2625, %v186_v50  }
  0x93   : > { %317 = vperm.xlu1 %2628, %v186_v50  }
  0x96   : > { %493 = vperm.xlu0 %2625, %v187_v51  }
  0x97   : > { %322 = vperm.xlu1 %2628, %v187_v51  }
  0x9a   : > { %497 = vperm.xlu0 %2625, %v188_v52  }
  0x9b   : > { %327 = vperm.xlu1 %2628, %v188_v52   ;;  %v2525_v52 = vpack.c.bf16 %v948_v47, %v947_v46 }
  0x9d   : > { %2526 = vmatprep.subr.bf16.mxu1 %v2525_v52 }
  0x9e   : > { %501 = vperm.xlu0 %2625, %v189_v53   ;;  %2528 = vmatpush3.bf16.msra.mxu1 %v2525_v52 }
  0x9f   : > { %332 = vperm.xlu1 %2628, %v189_v53  }
  0xa2   : > { %505 = vperm.xlu0 %2625, %v190_v54  }
  0xa3   : > { %337 = vperm.xlu1 %2628, %v190_v54  }
  0xa6   : > { %509 = vperm.xlu0 %2625, %v191_v55  }
  0xa7   : > { %342 = vperm.xlu1 %2628, %v191_v55  }
  0xaa   : > { %513 = vperm.xlu0 %2625, %v192_v56  }
  0xab   : > { %347 = vperm.xlu1 %2628, %v192_v56   ;;  %v949_v56 = vld [vmem:[#allocation2 + $0x170] sm:$0xff] }
  0xae   : > { %517 = vperm.xlu0 %2625, %v193_v57  }
  0xaf   : > { %352 = vperm.xlu1 %2628, %v193_v57   ;;  %v950_v57 = vld [vmem:[#allocation2 + $0x178] sm:$0xff] }
  0xb0   : > { %v203_v58 = vpop.permute.xlu1 %202  ;;  %v198_v59 = vpop.permute.xlu0 %197 }
  0xb1   : > { %v360_v0 = vmul.f32 %v2845_v60, %v203_v58  ;;  %v359_v1 = vmul.f32 %v2845_v60, %v198_v59 }
  0xb5   : > { %v398_v62 = vpop.permute.xlu1 %397  ;;  %v394_v63 = vpop.permute.xlu0 %393 }
  0xb6   : > { %v525_v2 = vmul.f32 %v2847_v61, %v398_v62  ;;  %v524_v3 = vmul.f32 %v2847_v61, %v394_v63 }
  0xb8   : > { %v557_v8 = vadd.f32 %v525_v2, %v360_v0  ;;  %v556_v9 = vadd.f32 %v524_v3, %v359_v1  ;;  %v2529_v0 = vpack.c.bf16 %v950_v57, %v949_v56 }
  0xb9   : > { %v402_v12 = vpop.permute.xlu0 %401 }
  0xba   : > { %v526_v16 = vmul.f32 %v2847_v61, %v402_v12  ;;  %v208_v17 = vpop.permute.xlu1 %207  ;;  %v593_v18 = vadd.f32 %v2853_v4, %v556_v9  ;;  %v594_v19 = vadd.f32 %v2853_v4, %v557_v8  ;;  %2530 = vmatprep.subr.bf16.mxu1 %v2529_v0 }
  0xbb   : > { %v361_v20 = vmul.f32 %v2845_v60, %v208_v17  ;;  %2532 = vmatpush3.bf16.msra.mxu1 %v2529_v0 }
  0xbc   : > { %v625_v21 = vmax.f32 %v593_v18, 0.0  ;;  %v626_v22 = vmax.f32 %v594_v19, 0.0 }
  0xbd   : > { %v558_v24 = vadd.f32 %v526_v16, %v361_v20  ;;  %v406_v25 = vpop.permute.xlu0 %405 }
  0xbe   : > { %v527_v28 = vmul.f32 %v2847_v61, %v406_v25  ;;  %v213_v29 = vpop.permute.xlu1 %212  ;;  %2185 = vmatprep.mubr.f32.mxu0 %v625_v21 }
  0xbf   : > { %v362_v30 = vmul.f32 %v2845_v60, %v213_v29  ;;  %2186 = vmatmul.mubr.f32.vlgmr.msra.gmra.mrb[0].mxu0 %v626_v22  ;;  %v595_v31 = vadd.f32 %v2853_v4, %v558_v24 }
  0xc1   : > { %v559_v33 = vadd.f32 %v527_v28, %v362_v30  ;;  %v410_v34 = vpop.permute.xlu0 %409  ;;  %v627_v35 = vmax.f32 %v595_v31, 0.0 }
  0xc2   : > { %v528_v38 = vmul.f32 %v2847_v61, %v410_v34  ;;  %v218_v39 = vpop.permute.xlu1 %217 }
  0xc3   : > { %v363_v40 = vmul.f32 %v2845_v60, %v218_v39  ;;  %2188 = vmatprep.mubr.f32.mxu0 %v627_v35  ;;  %v596_v41 = vadd.f32 %v2853_v4, %v559_v33 }
  0xc5   : > { %v560_v43 = vadd.f32 %v528_v38, %v363_v40  ;;  %v414_v44 = vpop.permute.xlu0 %413  ;;  %v628_v45 = vmax.f32 %v596_v41, 0.0 }
  0xc6   : > { %v529_v48 = vmul.f32 %v2847_v61, %v414_v44  ;;  %v223_v49 = vpop.permute.xlu1 %222 }
  0xc7   : > { %v364_v50 = vmul.f32 %v2845_v60, %v223_v49  ;;  %2189 = vmatmul.mubr.f32.gmra.mrb[2].mxu0 %v628_v45  ;;  %v597_v51 = vadd.f32 %v2853_v4, %v560_v43 }
  0xc9   : > { %v561_v53 = vadd.f32 %v529_v48, %v364_v50  ;;  %v418_v54 = vpop.permute.xlu0 %417  ;;  %v629_v55 = vmax.f32 %v597_v51, 0.0 }
  0xca   : > { %v530_v58 = vmul.f32 %v2847_v61, %v418_v54  ;;  %v228_v59 = vpop.permute.xlu1 %227 }
  0xcb   : > { %v365_v62 = vmul.f32 %v2845_v60, %v228_v59  ;;  %2191 = vmatprep.mubr.f32.mxu0 %v629_v55  ;;  %v598_v63 = vadd.f32 %v2853_v4, %v561_v53 }
  0xcd   : > { %v562_v1 = vadd.f32 %v530_v58, %v365_v62  ;;  %v422_v2 = vpop.permute.xlu0 %421  ;;  %v630_v3 = vmax.f32 %v598_v63, 0.0 }
  0xce   : > { %v531_v5 = vmul.f32 %v2847_v61, %v422_v2  ;;  %v233_v6 = vpop.permute.xlu1 %232 }
  0xcf   : > { %v366_v7 = vmul.f32 %v2845_v60, %v233_v6  ;;  %2192 = vmatmul.mubr.f32.gmra.mrb[4].mxu0 %v630_v3  ;;  %v599_v8 = vadd.f32 %v2853_v4, %v562_v1 }
  0xd1   : > { %v563_v9 = vadd.f32 %v531_v5, %v366_v7  ;;  %v426_v10 = vpop.permute.xlu0 %425  ;;  %v631_v11 = vmax.f32 %v599_v8, 0.0 }
  0xd2   : > { %v532_v12 = vmul.f32 %v2847_v61, %v426_v10  ;;  %v238_v13 = vpop.permute.xlu1 %237 }
  0xd3   : > { %v367_v14 = vmul.f32 %v2845_v60, %v238_v13  ;;  %2194 = vmatprep.mubr.f32.mxu0 %v631_v11  ;;  %v600_v15 = vadd.f32 %v2853_v4, %v563_v9 }
  0xd5   : > { %v564_v16 = vadd.f32 %v532_v12, %v367_v14  ;;  %v430_v17 = vpop.permute.xlu0 %429  ;;  %v632_v18 = vmax.f32 %v600_v15, 0.0 }
  0xd6   : > { %v533_v19 = vmul.f32 %v2847_v61, %v430_v17  ;;  %v243_v20 = vpop.permute.xlu1 %242 }
  0xd7   : > { %v368_v21 = vmul.f32 %v2845_v60, %v243_v20  ;;  %2195 = vmatmul.mubr.f32.gmra.mrb[6].mxu0 %v632_v18  ;;  %v601_v22 = vadd.f32 %v2853_v4, %v564_v16 }
  0xd9   : > { %v565_v23 = vadd.f32 %v533_v19, %v368_v21  ;;  %v434_v24 = vpop.permute.xlu0 %433  ;;  %v633_v25 = vmax.f32 %v601_v22, 0.0 }
  0xda   : > { %v534_v26 = vmul.f32 %v2847_v61, %v434_v24  ;;  %v248_v27 = vpop.permute.xlu1 %247 }
  0xdb   : > { %v369_v28 = vmul.f32 %v2845_v60, %v248_v27  ;;  %2197 = vmatprep.mubr.f32.mxu0 %v633_v25  ;;  %v602_v29 = vadd.f32 %v2853_v4, %v565_v23 }
  0xdd   : > { %v566_v30 = vadd.f32 %v534_v26, %v369_v28  ;;  %v438_v31 = vpop.permute.xlu0 %437  ;;  %v634_v32 = vmax.f32 %v602_v29, 0.0 }
  0xde   : > { %v535_v33 = vmul.f32 %v2847_v61, %v438_v31  ;;  %v253_v34 = vpop.permute.xlu1 %252 }
  0xdf   : > { %v370_v35 = vmul.f32 %v2845_v60, %v253_v34  ;;  %2198 = vmatmul.mubr.f32.gmra.mrb[8].mxu0 %v634_v32  ;;  %v603_v36 = vadd.f32 %v2853_v4, %v566_v30 }
  0xe1   : > { %v567_v37 = vadd.f32 %v535_v33, %v370_v35  ;;  %v442_v38 = vpop.permute.xlu0 %441  ;;  %v635_v39 = vmax.f32 %v603_v36, 0.0 }
  0xe2   : > { %v536_v40 = vmul.f32 %v2847_v61, %v442_v38  ;;  %v258_v41 = vpop.permute.xlu1 %257 }
  0xe3   : > { %v371_v42 = vmul.f32 %v2845_v60, %v258_v41  ;;  %2200 = vmatprep.mubr.f32.mxu0 %v635_v39  ;;  %v604_v43 = vadd.f32 %v2853_v4, %v567_v37 }
  0xe5   : > { %v568_v44 = vadd.f32 %v536_v40, %v371_v42  ;;  %v446_v45 = vpop.permute.xlu0 %445  ;;  %v636_v46 = vmax.f32 %v604_v43, 0.0 }
  0xe6   : > { %v537_v47 = vmul.f32 %v2847_v61, %v446_v45  ;;  %v263_v48 = vpop.permute.xlu1 %262 }
  0xe7   : > { %v372_v49 = vmul.f32 %v2845_v60, %v263_v48  ;;  %2201 = vmatmul.mubr.f32.gmra.mrb[10].mxu0 %v636_v46  ;;  %v605_v50 = vadd.f32 %v2853_v4, %v568_v44 }
  0xe9   : > { %v569_v51 = vadd.f32 %v537_v47, %v372_v49  ;;  %v450_v52 = vpop.permute.xlu0 %449  ;;  %v637_v53 = vmax.f32 %v605_v50, 0.0 }
  0xea   : > { %v538_v54 = vmul.f32 %v2847_v61, %v450_v52  ;;  %v268_v55 = vpop.permute.xlu1 %267 }
  0xeb   : > { %v373_v56 = vmul.f32 %v2845_v60, %v268_v55  ;;  %2203 = vmatprep.mubr.f32.mxu0 %v637_v53  ;;  %v606_v57 = vadd.f32 %v2853_v4, %v569_v51 }
  0xed   : > { %v570_v58 = vadd.f32 %v538_v54, %v373_v56  ;;  %v454_v59 = vpop.permute.xlu0 %453  ;;  %v638_v62 = vmax.f32 %v606_v57, 0.0 }
  0xee   : > { %v539_v63 = vmul.f32 %v2847_v61, %v454_v59  ;;  %v273_v0 = vpop.permute.xlu1 %272 }
  0xef   : > { %v374_v1 = vmul.f32 %v2845_v60, %v273_v0  ;;  %2204 = vmatmul.mubr.f32.gmra.mrb[12].mxu0 %v638_v62  ;;  %v607_v2 = vadd.f32 %v2853_v4, %v570_v58 }
  0xf1   : > { %v571_v3 = vadd.f32 %v539_v63, %v374_v1  ;;  %v458_v5 = vpop.permute.xlu0 %457  ;;  %v639_v6 = vmax.f32 %v607_v2, 0.0 }
  0xf2   : > { %v540_v7 = vmul.f32 %v2847_v61, %v458_v5  ;;  %v278_v8 = vpop.permute.xlu1 %277  ;;  %v952_v5 = vld [vmem:[#allocation2 + $0x188] sm:$0xff] }
  0xf3   : > { %v375_v9 = vmul.f32 %v2845_v60, %v278_v8  ;;  %2206 = vmatprep.mubr.f32.mxu0 %v639_v6  ;;  %v608_v10 = vadd.f32 %v2853_v4, %v571_v3  ;;  %v951_v3 = vld [vmem:[#allocation2 + $0x180] sm:$0xff] }
  0xf4   : > { %v2533_v8 = vpack.c.bf16 %v952_v5, %v951_v3  ;;  %v1218_v3 = vld [vmem:[#allocation2 + $0x1a8] sm:$0xff] }
  0xf5   : > { %v572_v11 = vadd.f32 %v540_v7, %v375_v9  ;;  %v462_v12 = vpop.permute.xlu0 %461  ;;  %v640_v13 = vmax.f32 %v608_v10, 0.0 }
  0xf6   : > { %v541_v14 = vmul.f32 %v2847_v61, %v462_v12  ;;  %v283_v15 = vpop.permute.xlu1 %282  ;;  %2534 = vmatprep.subr.bf16.mxu1 %v2533_v8 }
  0xf7   : > { %v376_v16 = vmul.f32 %v2845_v60, %v283_v15  ;;  %2207 = vmatmul.mubr.f32.gmra.mrb[14].mxu0 %v640_v13  ;;  %v609_v17 = vadd.f32 %v2853_v4, %v572_v11  ;;  %2536 = vmatpush3.bf16.msra.mxu1 %v2533_v8 }
  0xf9   : > { %v573_v18 = vadd.f32 %v541_v14, %v376_v16  ;;  %v466_v19 = vpop.permute.xlu0 %465  ;;  %v641_v20 = vmax.f32 %v609_v17, 0.0 }
  0xfa   : > { %v542_v21 = vmul.f32 %v2847_v61, %v466_v19  ;;  %v288_v22 = vpop.permute.xlu1 %287 }
  0xfb   : > { %v377_v23 = vmul.f32 %v2845_v60, %v288_v22  ;;  %2209 = vmatprep.mubr.f32.mxu0 %v641_v20  ;;  %v610_v24 = vadd.f32 %v2853_v4, %v573_v18 }
  0xfd   : > { %v574_v25 = vadd.f32 %v542_v21, %v377_v23  ;;  %v470_v26 = vpop.permute.xlu0 %469  ;;  %v642_v27 = vmax.f32 %v610_v24, 0.0 }
  0xfe   : > { %v543_v28 = vmul.f32 %v2847_v61, %v470_v26  ;;  %v293_v29 = vpop.permute.xlu1 %292 }
  0xff   : > { %v378_v30 = vmul.f32 %v2845_v60, %v293_v29  ;;  %2210 = vmatmul.mubr.f32.gmra.mrb[16].mxu0 %v642_v27  ;;  %v611_v31 = vadd.f32 %v2853_v4, %v574_v25 }
 0x101   : > { %v575_v32 = vadd.f32 %v543_v28, %v378_v30  ;;  %v474_v33 = vpop.permute.xlu0 %473  ;;  %v643_v34 = vmax.f32 %v611_v31, 0.0 }
 0x102   : > { %v544_v35 = vmul.f32 %v2847_v61, %v474_v33  ;;  %v298_v36 = vpop.permute.xlu1 %297 }
 0x103   : > { %v379_v37 = vmul.f32 %v2845_v60, %v298_v36  ;;  %2212 = vmatprep.mubr.f32.mxu0 %v643_v34  ;;  %v612_v38 = vadd.f32 %v2853_v4, %v575_v32 }
 0x105   : > { %v576_v39 = vadd.f32 %v544_v35, %v379_v37  ;;  %v478_v40 = vpop.permute.xlu0 %477  ;;  %v644_v41 = vmax.f32 %v612_v38, 0.0 }
 0x106   : > { %v545_v42 = vmul.f32 %v2847_v61, %v478_v40  ;;  %v303_v43 = vpop.permute.xlu1 %302 }
 0x107   : > { %v380_v44 = vmul.f32 %v2845_v60, %v303_v43  ;;  %2213 = vmatmul.mubr.f32.gmra.mrb[18].mxu0 %v644_v41  ;;  %v613_v45 = vadd.f32 %v2853_v4, %v576_v39 }
 0x109   : > { %v577_v46 = vadd.f32 %v545_v42, %v380_v44  ;;  %v482_v47 = vpop.permute.xlu0 %481  ;;  %v645_v48 = vmax.f32 %v613_v45, 0.0 }
 0x10a   : > { %v546_v49 = vmul.f32 %v2847_v61, %v482_v47  ;;  %v308_v50 = vpop.permute.xlu1 %307 }
 0x10b   : > { %v381_v51 = vmul.f32 %v2845_v60, %v308_v50  ;;  %2215 = vmatprep.mubr.f32.mxu0 %v645_v48  ;;  %v614_v52 = vadd.f32 %v2853_v4, %v577_v46 }
 0x10d   : > { %v578_v53 = vadd.f32 %v546_v49, %v381_v51  ;;  %v486_v54 = vpop.permute.xlu0 %485  ;;  %v646_v55 = vmax.f32 %v614_v52, 0.0 }
 0x10e   : > { %v547_v56 = vmul.f32 %v2847_v61, %v486_v54  ;;  %v313_v57 = vpop.permute.xlu1 %312 }
 0x10f   : > { %v382_v58 = vmul.f32 %v2845_v60, %v313_v57  ;;  %2216 = vmatmul.mubr.f32.gmra.mrb[20].mxu0 %v646_v55  ;;  %v615_v59 = vadd.f32 %v2853_v4, %v578_v53 }
 0x111   : > { %v579_v62 = vadd.f32 %v547_v56, %v382_v58  ;;  %v490_v63 = vpop.permute.xlu0 %489  ;;  %v647_v0 = vmax.f32 %v615_v59, 0.0 }
 0x112   : > { %v548_v1 = vmul.f32 %v2847_v61, %v490_v63  ;;  %v318_v2 = vpop.permute.xlu1 %317 }
 0x113   : > { %v383_v6 = vmul.f32 %v2845_v60, %v318_v2  ;;  %2218 = vmatprep.mubr.f32.mxu0 %v647_v0  ;;  %v616_v7 = vadd.f32 %v2853_v4, %v579_v62  ;;  %v2947_v0 = vld [vmem:[#allocation2 + $0x108] ss:$0 sm:$0xff]  ;;  %v1217_v2 = vld [vmem:[#allocation2 + $0x1a0] sm:$0xff] }
 0x115   : > { %v580_v9 = vadd.f32 %v548_v1, %v383_v6  ;;  %v494_v10 = vpop.permute.xlu0 %493  ;;  %v648_v11 = vmax.f32 %v616_v7, 0.0  ;;  %v1216_v1 = vld [vmem:[#allocation2 + $0x198] sm:$0xff]  ;;  %v1219_v6 = vld [vmem:[#allocation2 + $0x1b0] sm:$0xff] }
 0x116   : > { %v549_v12 = vmul.f32 %v2847_v61, %v494_v10  ;;  %v323_v13 = vpop.permute.xlu1 %322  ;;  %v2541_v8 = vpack.c.bf16 %v1219_v6, %v1218_v3  ;;  %v1221_v10 = vld [vmem:[#allocation2 + $0x1c0] sm:$0xff] }
 0x117   : > { %v384_v14 = vmul.f32 %v2845_v60, %v323_v13  ;;  %2219 = vmatmul.mubr.f32.gmra.mrb[22].mxu0 %v648_v11  ;;  %v617_v15 = vadd.f32 %v2853_v4, %v580_v9  ;;  %v1220_v9 = vld [vmem:[#allocation2 + $0x1b8] sm:$0xff] }
 0x119   : > { %v581_v16 = vadd.f32 %v549_v12, %v384_v14  ;;  %v498_v17 = vpop.permute.xlu0 %497  ;;  %v649_v18 = vmax.f32 %v617_v15, 0.0  ;;  %v2545_v12 = vpack.c.bf16 %v1221_v10, %v1220_v9  ;;  %v1222_v14 = vld [vmem:[#allocation2 + $0x1c8] sm:$0xff]  ;;  %v1223_v15 = vld [vmem:[#allocation2 + $0x1d0] sm:$0xff] }
 0x11a   : > { %v550_v19 = vmul.f32 %v2847_v61, %v498_v17  ;;  %v328_v20 = vpop.permute.xlu1 %327  ;;  %v2549_v17 = vpack.c.bf16 %v1223_v15, %v1222_v14 }
 0x11b   : > { %v385_v21 = vmul.f32 %v2845_v60, %v328_v20  ;;  %2221 = vmatprep.mubr.f32.mxu0 %v649_v18  ;;  %v618_v22 = vadd.f32 %v2853_v4, %v581_v16  ;;  %v1224_v20 = vld [vmem:[#allocation2 + $0x1d8] sm:$0xff] }
 0x11d   : > { %v582_v23 = vadd.f32 %v550_v19, %v385_v21  ;;  %v502_v24 = vpop.permute.xlu0 %501  ;;  %v650_v25 = vmax.f32 %v618_v22, 0.0  ;;  %v1225_v21 = vld [vmem:[#allocation2 + $0x1e0] sm:$0xff] }
 0x11e   : > { %v551_v26 = vmul.f32 %v2847_v61, %v502_v24  ;;  %v333_v27 = vpop.permute.xlu1 %332  ;;  %v2553_v24 = vpack.c.bf16 %v1225_v21, %v1224_v20 }
 0x11f   : > { %v386_v28 = vmul.f32 %v2845_v60, %v333_v27  ;;  %2222 = vmatmul.mubr.f32.gmra.mrb[24].mxu0 %v650_v25  ;;  %v619_v29 = vadd.f32 %v2853_v4, %v582_v23  ;;  %v1227_v27 = vld [vmem:[#allocation2 + $0x1f0] sm:$0xff] }
 0x121   : > { %v583_v30 = vadd.f32 %v551_v26, %v386_v28  ;;  %v506_v31 = vpop.permute.xlu0 %505  ;;  %v651_v32 = vmax.f32 %v619_v29, 0.0  ;;  %v1226_v26 = vld [vmem:[#allocation2 + $0x1e8] sm:$0xff] }
 0x122   : > { %v552_v33 = vmul.f32 %v2847_v61, %v506_v31  ;;  %v338_v34 = vpop.permute.xlu1 %337  ;;  %v2557_v29 = vpack.c.bf16 %v1227_v27, %v1226_v26  ;;  %v1230_v27 = vld [vmem:[#allocation2 + $0x208] sm:$0xff] }
 0x123   : > { %v387_v35 = vmul.f32 %v2845_v60, %v338_v34  ;;  %2224 = vmatprep.mubr.f32.mxu0 %v651_v32  ;;  %v620_v36 = vadd.f32 %v2853_v4, %v583_v30  ;;  %v1228_v32 = vld [vmem:[#allocation2 + $0x1f8] sm:$0xff] }
 0x125   : > { %v584_v37 = vadd.f32 %v552_v33, %v387_v35  ;;  %v510_v38 = vpop.permute.xlu0 %509  ;;  %v652_v39 = vmax.f32 %v620_v36, 0.0  ;;  %v1229_v33 = vld [vmem:[#allocation2 + $0x200] sm:$0xff] }
 0x126   : > { %v553_v40 = vmul.f32 %v2847_v61, %v510_v38  ;;  %v343_v41 = vpop.permute.xlu1 %342  ;;  %v2561_v36 = vpack.c.bf16 %v1229_v33, %v1228_v32 }
 0x127   : > { %v388_v42 = vmul.f32 %v2845_v60, %v343_v41  ;;  %2225 = vmatmul.mubr.f32.gmra.mrb[26].mxu0 %v652_v39  ;;  %v621_v43 = vadd.f32 %v2853_v4, %v584_v37 }
 0x129   : > { %v585_v44 = vadd.f32 %v553_v40, %v388_v42  ;;  %v514_v45 = vpop.permute.xlu0 %513  ;;  %v653_v46 = vmax.f32 %v621_v43, 0.0 }
 0x12a   : > { %v554_v47 = vmul.f32 %v2847_v61, %v514_v45  ;;  %v348_v48 = vpop.permute.xlu1 %347 }
 0x12b   : > { %v389_v49 = vmul.f32 %v2845_v60, %v348_v48  ;;  %2227 = vmatprep.mubr.f32.mxu0 %v653_v46  ;;  %v622_v50 = vadd.f32 %v2853_v4, %v585_v44 }
 0x12d   : > { %v586_v51 = vadd.f32 %v554_v47, %v389_v49  ;;  %v518_v52 = vpop.permute.xlu0 %517  ;;  %v654_v53 = vmax.f32 %v622_v50, 0.0 }
 0x12e   : > { %v555_v54 = vmul.f32 %v2847_v61, %v518_v52  ;;  %v353_v55 = vpop.permute.xlu1 %352  ;;  %v2537_v61 = vpack.c.bf16 %v1217_v2, %v1216_v1 }
 0x12f   : > { %v390_v56 = vmul.f32 %v2845_v60, %v353_v55  ;;  %2228 = vmatmul.mubr.f32.gmra.mrb[28].mxu0 %v654_v53  ;;  %v623_v57 = vadd.f32 %v2853_v4, %v586_v51 }
 0x130   : > { %2538 = vmatprep.subr.bf16.mxu0 %v2537_v61 }
 0x131   : > { %v587_v58 = vadd.f32 %v555_v54, %v390_v56  ;;  %v655_v59 = vmax.f32 %v623_v57, 0.0  ;;  %2540 = vmatpush3.bf16.msra.mxu0 %v2537_v61 }
 0x132   : > { %2542 = vmatprep.subr.bf16.mxu0 %v2541_v8 }
 0x133   : > { %2230 = vmatprep.mubr.f32.mxu0 %v655_v59  ;;  %v624_v62 = vadd.f32 %v2853_v4, %v587_v58 }
 0x135   : > { %v656_v63 = vmax.f32 %v624_v62, 0.0  ;;  %2544 = vmatpush3.bf16.msra.mxu0 %v2541_v8 }
 0x136   : > { %2546 = vmatprep.subr.bf16.mxu0 %v2545_v12 }
 0x137   : > { %2231 = vmatmul.mubr.f32.gmra.mrb[30].mxu0 %v656_v63 }
 0x139   : > { %2548 = vmatpush3.bf16.msra.mxu0 %v2545_v12 }
 0x13a   : > { %2550 = vmatprep.subr.bf16.mxu0 %v2549_v17 }
 0x13d   : > { %2552 = vmatpush3.bf16.msra.mxu0 %v2549_v17 }
 0x13e   : > { %2554 = vmatprep.subr.bf16.mxu0 %v2553_v24 }
 0x141   : > { %2556 = vmatpush3.bf16.msra.mxu0 %v2553_v24 }
 0x142   : > { %2558 = vmatprep.subr.bf16.mxu0 %v2557_v29 }
 0x145   : > { %2560 = vmatpush3.bf16.msra.mxu0 %v2557_v29 }
 0x146   : > { %2562 = vmatprep.subr.bf16.mxu0 %v2561_v36 }
 0x149   : > { %2564 = vmatpush3.bf16.msra.mxu0 %v2561_v36 }
 0x192   : > { %v2187_v5 = vpop.f32.mrb[0].mxu0 }
 0x193   : > { %v751_v60 = vadd.f32 %v2187_v5, %v2947_v0  ;;  %v745_v7 = vpop.f32.mrb[1].mxu0 }
 0x194   : > { %v746_v11 = vadd.f32 %v2947_v0, %v745_v7 }
 0x195   : > { %v905_v13 = vmax.f32 %v751_v60, 0.0 }
 0x196   : > { %v904_v4 = vmax.f32 %v746_v11, 0.0 }
 0x198   : > { %2265 = vmatprep.mubr.f32.mxu1 %v904_v4 }
 0x199   : > { %2266 = vmatmul.mubr.f32.vlgmr.msra.gmra.mrb[0].mxu1 %v905_v13 }
 0x19a   : > { %v2190_v16 = vpop.f32.mrb[2].mxu0 }
 0x19b   : > { %v761_v18 = vadd.f32 %v2190_v16, %v2947_v0  ;;  %v755_v19 = vpop.f32.mrb[3].mxu0 }
 0x19c   : > { %v756_v22 = vadd.f32 %v2947_v0, %v755_v19 }
 0x19d   : > { %v907_v25 = vmax.f32 %v761_v18, 0.0 }
 0x19e   : > { %v906_v23 = vmax.f32 %v756_v22, 0.0 }
 0x1a0   : > { %2268 = vmatprep.mubr.f32.mxu1 %v906_v23 }
 0x1a1   : > { %2269 = vmatmul.mubr.f32.gmra.mrb[2].mxu1 %v907_v25 }
 0x1a2   : > { %v2193_v28 = vpop.f32.mrb[4].mxu0 }
 0x1a3   : > { %v771_v30 = vadd.f32 %v2193_v28, %v2947_v0  ;;  %v765_v31 = vpop.f32.mrb[5].mxu0  ;;  %v1231_v28 = vld [vmem:[#allocation2 + $0x210] sm:$0xff] }
 0x1a4   : > { %v766_v34 = vadd.f32 %v2947_v0, %v765_v31  ;;  %v2565_v29 = vpack.c.bf16 %v1231_v28, %v1230_v27  ;;  %v1508_v27 = vld [vmem:[#allocation2 + $0x288] sm:$0xff] }
 0x1a5   : > { %v909_v37 = vmax.f32 %v771_v30, 0.0 }
 0x1a6   : > { %v908_v35 = vmax.f32 %v766_v34, 0.0  ;;  %2566 = vmatprep.subr.bf16.mxu0 %v2565_v29 }
 0x1a7   : > { %2568 = vmatpush3.bf16.msra.mxu0 %v2565_v29 }
 0x1a8   : > { %2271 = vmatprep.mubr.f32.mxu1 %v908_v35 }
 0x1a9   : > { %2272 = vmatmul.mubr.f32.gmra.mrb[4].mxu1 %v909_v37 }
 0x1aa   : > { %v2196_v38 = vpop.f32.mrb[6].mxu0 }
 0x1ab   : > { %v781_v39 = vadd.f32 %v2196_v38, %v2947_v0  ;;  %v775_v40 = vpop.f32.mrb[7].mxu0 }
 0x1ac   : > { %v776_v41 = vadd.f32 %v2947_v0, %v775_v40 }
 0x1ad   : > { %v911_v43 = vmax.f32 %v781_v39, 0.0 }
 0x1ae   : > { %v910_v42 = vmax.f32 %v776_v41, 0.0 }
 0x1b0   : > { %2274 = vmatprep.mubr.f32.mxu1 %v910_v42 }
 0x1b1   : > { %2275 = vmatmul.mubr.f32.gmra.mrb[6].mxu1 %v911_v43 }
 0x1b2   : > { %v2199_v44 = vpop.f32.mrb[8].mxu0 }
 0x1b3   : > { %v791_v45 = vadd.f32 %v2199_v44, %v2947_v0  ;;  %v785_v46 = vpop.f32.mrb[9].mxu0 }
 0x1b4   : > { %v786_v47 = vadd.f32 %v2947_v0, %v785_v46 }
 0x1b5   : > { %v913_v49 = vmax.f32 %v791_v45, 0.0 }
 0x1b6   : > { %v912_v48 = vmax.f32 %v786_v47, 0.0 }
 0x1b8   : > { %2277 = vmatprep.mubr.f32.mxu1 %v912_v48 }
 0x1b9   : > { %2278 = vmatmul.mubr.f32.gmra.mrb[8].mxu1 %v913_v49 }
 0x1ba   : > { %v2202_v50 = vpop.f32.mrb[10].mxu0 }
 0x1bb   : > { %v801_v51 = vadd.f32 %v2202_v50, %v2947_v0  ;;  %v795_v52 = vpop.f32.mrb[11].mxu0 }
 0x1bc   : > { %v796_v53 = vadd.f32 %v2947_v0, %v795_v52 }
 0x1bd   : > { %v915_v55 = vmax.f32 %v801_v51, 0.0 }
 0x1be   : > { %v914_v54 = vmax.f32 %v796_v53, 0.0 }
 0x1c0   : > { %2280 = vmatprep.mubr.f32.mxu1 %v914_v54 }
 0x1c1   : > { %2281 = vmatmul.mubr.f32.gmra.mrb[10].mxu1 %v915_v55 }
 0x1c2   : > { %v2205_v56 = vpop.f32.mrb[12].mxu0 }
 0x1c3   : > { %v811_v57 = vadd.f32 %v2205_v56, %v2947_v0  ;;  %v805_v58 = vpop.f32.mrb[13].mxu0  ;;  %v2981_v56 = vld [vmem:[#allocation2 + $0x190] ss:$0 sm:$0xff] }
 0x1c4   : > { %v806_v59 = vadd.f32 %v2947_v0, %v805_v58  ;;  %v1496_v58 = vld [vmem:[#allocation2 + $0x228] sm:$0xff] }
 0x1c5   : > { %v917_v63 = vmax.f32 %v811_v57, 0.0  ;;  %v1495_v57 = vld [vmem:[#allocation2 + $0x220] sm:$0xff] }
 0x1c6   : > { %v916_v62 = vmax.f32 %v806_v59, 0.0  ;;  %v1497_v59 = vld [vmem:[#allocation2 + $0x230] sm:$0xff] }
 0x1c8   : > { %2283 = vmatprep.mubr.f32.mxu1 %v916_v62 }
 0x1c9   : > { %2284 = vmatmul.mubr.f32.gmra.mrb[12].mxu1 %v917_v63  ;;  %v2569_v63 = vpack.c.bf16 %v1496_v58, %v1495_v57 }
 0x1ca   : > { %v2208_v1 = vpop.f32.mrb[14].mxu0 }
 0x1cb   : > { %v821_v2 = vadd.f32 %v2208_v1, %v2947_v0  ;;  %v815_v3 = vpop.f32.mrb[15].mxu0  ;;  %v1498_v1 = vld [vmem:[#allocation2 + $0x238] sm:$0xff]  ;;  %2570 = vmatprep.subr.bf16.mxu1 %v2569_v63 }
 0x1cc   : > { %v816_v5 = vadd.f32 %v2947_v0, %v815_v3  ;;  %2572 = vmatpush3.bf16.msra.mxu1 %v2569_v63 }
 0x1cd   : > { %v919_v6 = vmax.f32 %v821_v2, 0.0 }
 0x1ce   : > { %v918_v61 = vmax.f32 %v816_v5, 0.0  ;;  %v2573_v5 = vpack.c.bf16 %v1498_v1, %v1497_v59 }
 0x1d0   : > { %2286 = vmatprep.mubr.f32.mxu1 %v918_v61  ;;  %v1499_v61 = vld [vmem:[#allocation2 + $0x240] sm:$0xff]  ;;  %2574 = vmatprep.subr.bf16.mxu1 %v2573_v5 }
 0x1d1   : > { %2287 = vmatmul.mubr.f32.gmra.mrb[14].mxu1 %v919_v6  ;;  %v1500_v6 = vld [vmem:[#allocation2 + $0x248] sm:$0xff] }
 0x1d2   : > { %v2211_v60 = vpop.f32.mrb[16].mxu0  ;;  %2576 = vmatpush3.bf16.msra.mxu1 %v2573_v5 }
 0x1d3   : > { %v831_v7 = vadd.f32 %v2211_v60, %v2947_v0  ;;  %v825_v8 = vpop.f32.mrb[17].mxu0 }
 0x1d4   : > { %v826_v9 = vadd.f32 %v2947_v0, %v825_v8 }
 0x1d5   : > { %v921_v11 = vmax.f32 %v831_v7, 0.0  ;;  %v2577_v7 = vpack.c.bf16 %v1500_v6, %v1499_v61 }
 0x1d6   : > { %v920_v10 = vmax.f32 %v826_v9, 0.0  ;;  %v1501_v9 = vld [vmem:[#allocation2 + $0x250] sm:$0xff] }
 0x1d7   : > { %2578 = vmatprep.subr.bf16.mxu1 %v2577_v7 }
 0x1d8   : > { %2289 = vmatprep.mubr.f32.mxu1 %v920_v10  ;;  %v1502_v10 = vld [vmem:[#allocation2 + $0x258] sm:$0xff]  ;;  %2580 = vmatpush3.bf16.msra.mxu1 %v2577_v7 }
 0x1d9   : > { %2290 = vmatmul.mubr.f32.gmra.mrb[16].mxu1 %v921_v11 }
 0x1da   : > { %v2214_v4 = vpop.f32.mrb[18].mxu0 }
 0x1db   : > { %v841_v12 = vadd.f32 %v2214_v4, %v2947_v0  ;;  %v835_v13 = vpop.f32.mrb[19].mxu0  ;;  %v2581_v4 = vpack.c.bf16 %v1502_v10, %v1501_v9 }
 0x1dc   : > { %v836_v14 = vadd.f32 %v2947_v0, %v835_v13 }
 0x1dd   : > { %v923_v16 = vmax.f32 %v841_v12, 0.0  ;;  %2582 = vmatprep.subr.bf16.mxu1 %v2581_v4 }
 0x1de   : > { %v922_v15 = vmax.f32 %v836_v14, 0.0  ;;  %v1503_v14 = vld [vmem:[#allocation2 + $0x260] sm:$0xff]  ;;  %2584 = vmatpush3.bf16.msra.mxu1 %v2581_v4 }
 0x1e0   : > { %2292 = vmatprep.mubr.f32.mxu1 %v922_v15  ;;  %v1504_v15 = vld [vmem:[#allocation2 + $0x268] sm:$0xff] }
 0x1e1   : > { %2293 = vmatmul.mubr.f32.gmra.mrb[18].mxu1 %v923_v16 }
 0x1e2   : > { %v2217_v17 = vpop.f32.mrb[20].mxu0 }
 0x1e3   : > { %v851_v18 = vadd.f32 %v2217_v17, %v2947_v0  ;;  %v845_v19 = vpop.f32.mrb[21].mxu0 }
 0x1e4   : > { %v846_v20 = vadd.f32 %v2947_v0, %v845_v19 }
 0x1e5   : > { %v925_v22 = vmax.f32 %v851_v18, 0.0  ;;  %v2585_v18 = vpack.c.bf16 %v1504_v15, %v1503_v14 }
 0x1e6   : > { %v924_v21 = vmax.f32 %v846_v20, 0.0  ;;  %v1505_v20 = vld [vmem:[#allocation2 + $0x270] sm:$0xff] }
 0x1e7   : > { %2586 = vmatprep.subr.bf16.mxu1 %v2585_v18 }
 0x1e8   : > { %2295 = vmatprep.mubr.f32.mxu1 %v924_v21  ;;  %v1506_v21 = vld [vmem:[#allocation2 + $0x278] sm:$0xff]  ;;  %2588 = vmatpush3.bf16.msra.mxu1 %v2585_v18 }
 0x1e9   : > { %2296 = vmatmul.mubr.f32.gmra.mrb[20].mxu1 %v925_v22 }
 0x1ea   : > { %v2220_v23 = vpop.f32.mrb[22].mxu0 }
 0x1eb   : > { %v861_v24 = vadd.f32 %v2220_v23, %v2947_v0  ;;  %v855_v25 = vpop.f32.mrb[23].mxu0  ;;  %v2589_v23 = vpack.c.bf16 %v1506_v21, %v1505_v20  ;;  %v1509_v21 = vld [vmem:[#allocation2 + $0x290] sm:$0xff] }
 0x1ec   : > { %v856_v26 = vadd.f32 %v2947_v0, %v855_v25 }
 0x1ed   : > { %v927_v31 = vmax.f32 %v861_v24, 0.0  ;;  %2590 = vmatprep.subr.bf16.mxu1 %v2589_v23 }
 0x1ee   : > { %v926_v30 = vmax.f32 %v856_v26, 0.0  ;;  %v1507_v26 = vld [vmem:[#allocation2 + $0x280] sm:$0xff]  ;;  %2592 = vmatpush3.bf16.msra.mxu1 %v2589_v23 }
 0x1f0   : > { %2298 = vmatprep.mubr.f32.mxu1 %v926_v30  ;;  %v2593_v30 = vpack.c.bf16 %v1508_v27, %v1507_v26 }
 0x1f1   : > { %2299 = vmatmul.mubr.f32.gmra.mrb[22].mxu1 %v927_v31 }
 0x1f2   : > { %v2223_v32 = vpop.f32.mrb[24].mxu0  ;;  %2594 = vmatprep.subr.bf16.mxu1 %v2593_v30 }
 0x1f3   : > { %v871_v33 = vadd.f32 %v2223_v32, %v2947_v0  ;;  %v865_v34 = vpop.f32.mrb[25].mxu0  ;;  %2596 = vmatpush3.bf16.msra.mxu1 %v2593_v30 }
 0x1f4   : > { %v866_v35 = vadd.f32 %v2947_v0, %v865_v34 }
 0x1f5   : > { %v929_v37 = vmax.f32 %v871_v33, 0.0 }
 0x1f6   : > { %v928_v36 = vmax.f32 %v866_v35, 0.0 }
 0x1f8   : > { %2301 = vmatprep.mubr.f32.mxu1 %v928_v36 }
 0x1f9   : > { %2302 = vmatmul.mubr.f32.gmra.mrb[24].mxu1 %v929_v37 }
 0x1fa   : > { %v2226_v38 = vpop.f32.mrb[26].mxu0 }
 0x1fb   : > { %v881_v39 = vadd.f32 %v2226_v38, %v2947_v0  ;;  %v875_v40 = vpop.f32.mrb[27].mxu0 }
 0x1fc   : > { %v876_v41 = vadd.f32 %v2947_v0, %v875_v40 }
 0x1fd   : > { %v931_v43 = vmax.f32 %v881_v39, 0.0 }
 0x1fe   : > { %v930_v42 = vmax.f32 %v876_v41, 0.0 }
 0x200   : > { %2304 = vmatprep.mubr.f32.mxu1 %v930_v42 }
 0x201   : > { %2305 = vmatmul.mubr.f32.gmra.mrb[26].mxu1 %v931_v43 }
 0x202   : > { %v2229_v44 = vpop.f32.mrb[28].mxu0 }
 0x203   : > { %v891_v45 = vadd.f32 %v2229_v44, %v2947_v0  ;;  %v885_v46 = vpop.f32.mrb[29].mxu0 }
 0x204   : > { %v886_v47 = vadd.f32 %v2947_v0, %v885_v46 }
 0x205   : > { %v933_v49 = vmax.f32 %v891_v45, 0.0 }
 0x206   : > { %v932_v48 = vmax.f32 %v886_v47, 0.0 }
 0x208   : > { %2307 = vmatprep.mubr.f32.mxu1 %v932_v48 }
 0x209   : > { %2308 = vmatmul.mubr.f32.gmra.mrb[28].mxu1 %v933_v49 }
 0x20a   : > { %v2232_v50 = vpop.f32.mrb[30].mxu0 }
 0x20b   : > { %v901_v51 = vadd.f32 %v2232_v50, %v2947_v0  ;;  %v895_v52 = vpop.f32.mrb[31].mxu0 }
 0x20c   : > { %v896_v53 = vadd.f32 %v2947_v0, %v895_v52 }
 0x20d   : > { %v935_v55 = vmax.f32 %v901_v51, 0.0 }
 0x20e   : > { %v934_v54 = vmax.f32 %v896_v53, 0.0 }
 0x210   : > { %2310 = vmatprep.mubr.f32.mxu1 %v934_v54 }
 0x211   : > { %2311 = vmatmul.mubr.f32.gmra.mrb[30].mxu1 %v935_v55 }
 0x26c   : > { %v2267_v62 = vpop.f32.mrb[0].mxu1 }
 0x26d   : > { %v1030_v2 = vadd.f32 %v2267_v62, %v2981_v56  ;;  %v1024_v3 = vpop.f32.mrb[1].mxu1 }
 0x26e   : > { %v1025_v0 = vadd.f32 %v2981_v56, %v1024_v3 }
 0x26f   : > { %v1184_v8 = vmax.f32 %v1030_v2, 0.0 }
 0x270   : > { %v1183_v60 = vmax.f32 %v1025_v0, 0.0 }
 0x272   : > { %2345 = vmatprep.mubr.f32.mxu0 %v1183_v60 }
 0x273   : > { %2346 = vmatmul.mubr.f32.vlgmr.msra.gmra.mrb[32].mxu0 %v1184_v8 }
 0x274   : > { %v2270_v11 = vpop.f32.mrb[2].mxu1 }
 0x275   : > { %v1040_v12 = vadd.f32 %v2270_v11, %v2981_v56  ;;  %v1034_v13 = vpop.f32.mrb[3].mxu1 }
 0x276   : > { %v1035_v16 = vadd.f32 %v2981_v56, %v1034_v13 }
 0x277   : > { %v1186_v19 = vmax.f32 %v1040_v12, 0.0 }
 0x278   : > { %v1185_v17 = vmax.f32 %v1035_v16, 0.0 }
 0x27a   : > { %2348 = vmatprep.mubr.f32.mxu0 %v1185_v17 }
 0x27b   : > { %2349 = vmatmul.mubr.f32.gmra.mrb[34].mxu0 %v1186_v19 }
 0x27c   : > { %v2273_v22 = vpop.f32.mrb[4].mxu1 }
 0x27d   : > { %v1050_v24 = vadd.f32 %v2273_v22, %v2981_v56  ;;  %v1044_v25 = vpop.f32.mrb[5].mxu1  ;;  %v1510_v22 = vld [vmem:[#allocation2 + $0x298] sm:$0xff] }
 0x27e   : > { %v1045_v28 = vadd.f32 %v2981_v56, %v1044_v25  ;;  %v2597_v23 = vpack.c.bf16 %v1510_v22, %v1509_v21 }
 0x27f   : > { %v1188_v31 = vmax.f32 %v1050_v24, 0.0 }
 0x280   : > { %v1187_v29 = vmax.f32 %v1045_v28, 0.0  ;;  %2598 = vmatprep.subr.bf16.mxu1 %v2597_v23 }
 0x281   : > { %2600 = vmatpush3.bf16.msra.mxu1 %v2597_v23 }
 0x282   : > { %2351 = vmatprep.mubr.f32.mxu0 %v1187_v29 }
 0x283   : > { %2352 = vmatmul.mubr.f32.gmra.mrb[36].mxu0 %v1188_v31 }
 0x284   : > { %v2276_v32 = vpop.f32.mrb[6].mxu1 }
 0x285   : > { %v1060_v33 = vadd.f32 %v2276_v32, %v2981_v56  ;;  %v1054_v34 = vpop.f32.mrb[7].mxu1 }
 0x286   : > { %v1055_v35 = vadd.f32 %v2981_v56, %v1054_v34 }
 0x287   : > { %v1190_v37 = vmax.f32 %v1060_v33, 0.0 }
 0x288   : > { %v1189_v36 = vmax.f32 %v1055_v35, 0.0 }
 0x28a   : > { %2354 = vmatprep.mubr.f32.mxu0 %v1189_v36 }
 0x28b   : > { %2355 = vmatmul.mubr.f32.gmra.mrb[38].mxu0 %v1190_v37 }
 0x28c   : > { %v2279_v38 = vpop.f32.mrb[8].mxu1 }
 0x28d   : > { %v1070_v39 = vadd.f32 %v2279_v38, %v2981_v56  ;;  %v1064_v40 = vpop.f32.mrb[9].mxu1 }
 0x28e   : > { %v1065_v41 = vadd.f32 %v2981_v56, %v1064_v40 }
 0x28f   : > { %v1192_v43 = vmax.f32 %v1070_v39, 0.0 }
 0x290   : > { %v1191_v42 = vmax.f32 %v1065_v41, 0.0 }
 0x292   : > { %2357 = vmatprep.mubr.f32.mxu0 %v1191_v42 }
 0x293   : > { %2358 = vmatmul.mubr.f32.gmra.mrb[40].mxu0 %v1192_v43 }
 0x294   : > { %v2282_v44 = vpop.f32.mrb[10].mxu1 }
 0x295   : > { %v1080_v45 = vadd.f32 %v2282_v44, %v2981_v56  ;;  %v1074_v46 = vpop.f32.mrb[11].mxu1 }
 0x296   : > { %v1075_v47 = vadd.f32 %v2981_v56, %v1074_v46 }
 0x297   : > { %v1194_v49 = vmax.f32 %v1080_v45, 0.0 }
 0x298   : > { %v1193_v48 = vmax.f32 %v1075_v47, 0.0 }
 0x29a   : > { %2360 = vmatprep.mubr.f32.mxu0 %v1193_v48 }
 0x29b   : > { %2361 = vmatmul.mubr.f32.gmra.mrb[42].mxu0 %v1194_v49 }
 0x29c   : > { %v2285_v50 = vpop.f32.mrb[12].mxu1 }
 0x29d   : > { %v1090_v51 = vadd.f32 %v2285_v50, %v2981_v56  ;;  %v1084_v52 = vpop.f32.mrb[13].mxu1  ;;  %v3015_v50 = vld [vmem:[#allocation2 + $0x218] ss:$0 sm:$0xff] }
 0x29e   : > { %v1085_v53 = vadd.f32 %v2981_v56, %v1084_v52 }
 0x29f   : > { %v1196_v55 = vmax.f32 %v1090_v51, 0.0 }
 0x2a0   : > { %v1195_v54 = vmax.f32 %v1085_v53, 0.0 }
 0x2a2   : > { %2363 = vmatprep.mubr.f32.mxu0 %v1195_v54 }
 0x2a3   : > { %2364 = vmatmul.mubr.f32.gmra.mrb[44].mxu0 %v1196_v55 }
 0x2a4   : > { %v2288_v57 = vpop.f32.mrb[14].mxu1 }
 0x2a5   : > { %v1100_v58 = vadd.f32 %v2288_v57, %v2981_v56  ;;  %v1094_v59 = vpop.f32.mrb[15].mxu1 }
 0x2a6   : > { %v1095_v62 = vadd.f32 %v2981_v56, %v1094_v59 }
 0x2a7   : > { %v1198_v1 = vmax.f32 %v1100_v58, 0.0 }
 0x2a8   : > { %v1197_v63 = vmax.f32 %v1095_v62, 0.0 }
 0x2aa   : > { %2366 = vmatprep.mubr.f32.mxu0 %v1197_v63 }
 0x2ab   : > { %2367 = vmatmul.mubr.f32.gmra.mrb[46].mxu0 %v1198_v1 }
 0x2ac   : > { %v2291_v2 = vpop.f32.mrb[16].mxu1 }
 0x2ad   : > { %v1110_v3 = vadd.f32 %v2291_v2, %v2981_v56  ;;  %v1104_v5 = vpop.f32.mrb[17].mxu1 }
 0x2ae   : > { %v1105_v61 = vadd.f32 %v2981_v56, %v1104_v5 }
 0x2af   : > { %v1200_v0 = vmax.f32 %v1110_v3, 0.0 }
 0x2b0   : > { %v1199_v6 = vmax.f32 %v1105_v61, 0.0 }
 0x2b2   : > { %2369 = vmatprep.mubr.f32.mxu0 %v1199_v6 }
 0x2b3   : > { %2370 = vmatmul.mubr.f32.gmra.mrb[48].mxu0 %v1200_v0 }
 0x2b4   : > { %v2294_v60 = vpop.f32.mrb[18].mxu1 }
 0x2b5   : > { %v1120_v7 = vadd.f32 %v2294_v60, %v2981_v56  ;;  %v1114_v8 = vpop.f32.mrb[19].mxu1 }
 0x2b6   : > { %v1115_v9 = vadd.f32 %v2981_v56, %v1114_v8 }
 0x2b7   : > { %v1202_v11 = vmax.f32 %v1120_v7, 0.0 }
 0x2b8   : > { %v1201_v10 = vmax.f32 %v1115_v9, 0.0 }
 0x2ba   : > { %2372 = vmatprep.mubr.f32.mxu0 %v1201_v10 }
 0x2bb   : > { %2373 = vmatmul.mubr.f32.gmra.mrb[50].mxu0 %v1202_v11 }
 0x2bc   : > { %v2297_v4 = vpop.f32.mrb[20].mxu1 }
 0x2bd   : > { %v1130_v12 = vadd.f32 %v2297_v4, %v2981_v56  ;;  %v1124_v13 = vpop.f32.mrb[21].mxu1 }
 0x2be   : > { %v1125_v14 = vadd.f32 %v2981_v56, %v1124_v13 }
 0x2bf   : > { %v1204_v16 = vmax.f32 %v1130_v12, 0.0 }
 0x2c0   : > { %v1203_v15 = vmax.f32 %v1125_v14, 0.0 }
 0x2c2   : > { %2375 = vmatprep.mubr.f32.mxu0 %v1203_v15 }
 0x2c3   : > { %2376 = vmatmul.mubr.f32.gmra.mrb[52].mxu0 %v1204_v16 }
 0x2c4   : > { %v2300_v17 = vpop.f32.mrb[22].mxu1 }
 0x2c5   : > { %v1140_v18 = vadd.f32 %v2300_v17, %v2981_v56  ;;  %v1134_v19 = vpop.f32.mrb[23].mxu1 }
 0x2c6   : > { %v1135_v20 = vadd.f32 %v2981_v56, %v1134_v19 }
 0x2c7   : > { %v1206_v25 = vmax.f32 %v1140_v18, 0.0 }
 0x2c8   : > { %v1205_v24 = vmax.f32 %v1135_v20, 0.0 }
 0x2ca   : > { %2378 = vmatprep.mubr.f32.mxu0 %v1205_v24 }
 0x2cb   : > { %2379 = vmatmul.mubr.f32.gmra.mrb[54].mxu0 %v1206_v25 }
 0x2cc   : > { %v2303_v26 = vpop.f32.mrb[24].mxu1 }
 0x2cd   : > { %v1150_v27 = vadd.f32 %v2303_v26, %v2981_v56  ;;  %v1144_v28 = vpop.f32.mrb[25].mxu1 }
 0x2ce   : > { %v1145_v29 = vadd.f32 %v2981_v56, %v1144_v28 }
 0x2cf   : > { %v1208_v31 = vmax.f32 %v1150_v27, 0.0 }
 0x2d0   : > { %v1207_v30 = vmax.f32 %v1145_v29, 0.0 }
 0x2d2   : > { %2381 = vmatprep.mubr.f32.mxu0 %v1207_v30 }
 0x2d3   : > { %2382 = vmatmul.mubr.f32.gmra.mrb[56].mxu0 %v1208_v31 }
 0x2d4   : > { %v2306_v32 = vpop.f32.mrb[26].mxu1 }
 0x2d5   : > { %v1160_v33 = vadd.f32 %v2306_v32, %v2981_v56  ;;  %v1154_v34 = vpop.f32.mrb[27].mxu1 }
 0x2d6   : > { %v1155_v35 = vadd.f32 %v2981_v56, %v1154_v34 }
 0x2d7   : > { %v1210_v37 = vmax.f32 %v1160_v33, 0.0 }
 0x2d8   : > { %v1209_v36 = vmax.f32 %v1155_v35, 0.0 }
 0x2da   : > { %2384 = vmatprep.mubr.f32.mxu0 %v1209_v36 }
 0x2db   : > { %2385 = vmatmul.mubr.f32.gmra.mrb[58].mxu0 %v1210_v37 }
 0x2dc   : > { %v2309_v38 = vpop.f32.mrb[28].mxu1 }
 0x2dd   : > { %v1170_v39 = vadd.f32 %v2309_v38, %v2981_v56  ;;  %v1164_v40 = vpop.f32.mrb[29].mxu1 }
 0x2de   : > { %v1165_v41 = vadd.f32 %v2981_v56, %v1164_v40 }
 0x2df   : > { %v1212_v43 = vmax.f32 %v1170_v39, 0.0 }
 0x2e0   : > { %v1211_v42 = vmax.f32 %v1165_v41, 0.0 }
 0x2e2   : > { %2387 = vmatprep.mubr.f32.mxu0 %v1211_v42 }
 0x2e3   : > { %2388 = vmatmul.mubr.f32.gmra.mrb[60].mxu0 %v1212_v43 }
 0x2e4   : > { %v2312_v44 = vpop.f32.mrb[30].mxu1 }
 0x2e5   : > { %v1180_v45 = vadd.f32 %v2312_v44, %v2981_v56  ;;  %v1174_v46 = vpop.f32.mrb[31].mxu1 }
 0x2e6   : > { %v1175_v47 = vadd.f32 %v2981_v56, %v1174_v46 }
 0x2e7   : > { %v1214_v49 = vmax.f32 %v1180_v45, 0.0 }
 0x2e8   : > { %v1213_v48 = vmax.f32 %v1175_v47, 0.0 }
 0x2ea   : > { %2390 = vmatprep.mubr.f32.mxu0 %v1213_v48 }
 0x2eb   : > { %2391 = vmatmul.mubr.f32.gmra.mrb[62].mxu0 %v1214_v49 }
 0x346   : > { %v2347_v51 = vpop.f32.mrb[32].mxu0 }
 0x347   : > { %v1309_v52 = vadd.f32 %v2347_v51, %v3015_v50  ;;  %v1303_v53 = vpop.f32.mrb[33].mxu0 }
 0x348   : > { %v1304_v54 = vadd.f32 %v3015_v50, %v1303_v53 }
 0x349   : > { %v1463_v57 = vmax.f32 %v1309_v52, 0.0 }
 0x34a   : > { %v1462_v55 = vmax.f32 %v1304_v54, 0.0 }
 0x34c   : > { %2425 = vmatprep.mubr.f32.mxu1 %v1462_v55 }
 0x34d   : > { %2426 = vmatmul.mubr.f32.vlgmr.msra.gmra.mrb[32].mxu1 %v1463_v57 }
 0x34e   : > { %v2350_v58 = vpop.f32.mrb[34].mxu0 }
 0x34f   : > { %v1319_v59 = vadd.f32 %v2350_v58, %v3015_v50  ;;  %v1313_v56 = vpop.f32.mrb[35].mxu0 }
 0x350   : > { %v1314_v62 = vadd.f32 %v3015_v50, %v1313_v56 }
 0x351   : > { %v1465_v1 = vmax.f32 %v1319_v59, 0.0 }
 0x352   : > { %v1464_v63 = vmax.f32 %v1314_v62, 0.0 }
 0x354   : > { %2428 = vmatprep.mubr.f32.mxu1 %v1464_v63 }
 0x355   : > { %2429 = vmatmul.mubr.f32.gmra.mrb[34].mxu1 %v1465_v1 }
 0x356   : > { %v2353_v2 = vpop.f32.mrb[36].mxu0 }
 0x357   : > { %v1329_v3 = vadd.f32 %v2353_v2, %v3015_v50  ;;  %v1323_v5 = vpop.f32.mrb[37].mxu0 }
 0x358   : > { %v1324_v61 = vadd.f32 %v3015_v50, %v1323_v5 }
 0x359   : > { %v1467_v0 = vmax.f32 %v1329_v3, 0.0 }
 0x35a   : > { %v1466_v6 = vmax.f32 %v1324_v61, 0.0 }
 0x35c   : > { %2431 = vmatprep.mubr.f32.mxu1 %v1466_v6 }
 0x35d   : > { %2432 = vmatmul.mubr.f32.gmra.mrb[36].mxu1 %v1467_v0 }
 0x35e   : > { %v2356_v60 = vpop.f32.mrb[38].mxu0 }
 0x35f   : > { %v1339_v7 = vadd.f32 %v2356_v60, %v3015_v50  ;;  %v1333_v8 = vpop.f32.mrb[39].mxu0 }
 0x360   : > { %v1334_v9 = vadd.f32 %v3015_v50, %v1333_v8 }
 0x361   : > { %v1469_v11 = vmax.f32 %v1339_v7, 0.0 }
 0x362   : > { %v1468_v10 = vmax.f32 %v1334_v9, 0.0 }
 0x364   : > { %2434 = vmatprep.mubr.f32.mxu1 %v1468_v10 }
 0x365   : > { %2435 = vmatmul.mubr.f32.gmra.mrb[38].mxu1 %v1469_v11 }
 0x366   : > { %v2359_v4 = vpop.f32.mrb[40].mxu0 }
 0x367   : > { %v1349_v12 = vadd.f32 %v2359_v4, %v3015_v50  ;;  %v1343_v13 = vpop.f32.mrb[41].mxu0 }
 0x368   : > { %v1344_v14 = vadd.f32 %v3015_v50, %v1343_v13 }
 0x369   : > { %v1471_v16 = vmax.f32 %v1349_v12, 0.0 }
 0x36a   : > { %v1470_v15 = vmax.f32 %v1344_v14, 0.0 }
 0x36c   : > { %2437 = vmatprep.mubr.f32.mxu1 %v1470_v15 }
 0x36d   : > { %2438 = vmatmul.mubr.f32.gmra.mrb[40].mxu1 %v1471_v16 }
 0x36e   : > { %v2362_v17 = vpop.f32.mrb[42].mxu0 }
 0x36f   : > { %v1359_v18 = vadd.f32 %v2362_v17, %v3015_v50  ;;  %v1353_v19 = vpop.f32.mrb[43].mxu0 }
 0x370   : > { %v1354_v20 = vadd.f32 %v3015_v50, %v1353_v19 }
 0x371   : > { %v1473_v22 = vmax.f32 %v1359_v18, 0.0 }
 0x372   : > { %v1472_v21 = vmax.f32 %v1354_v20, 0.0  ;;  %v3049_v20 = vld [vmem:[#allocation2 + $0x2a0] ss:$0 sm:$0xff] }
 0x374   : > { %2440 = vmatprep.mubr.f32.mxu1 %v1472_v21 }
 0x375   : > { %2441 = vmatmul.mubr.f32.gmra.mrb[42].mxu1 %v1473_v22 }
 0x376   : > { %v2365_v23 = vpop.f32.mrb[44].mxu0 }
 0x377   : > { %v1369_v24 = vadd.f32 %v2365_v23, %v3015_v50  ;;  %v1363_v25 = vpop.f32.mrb[45].mxu0 }
 0x378   : > { %v1364_v26 = vadd.f32 %v3015_v50, %v1363_v25 }
 0x379   : > { %v1475_v28 = vmax.f32 %v1369_v24, 0.0 }
 0x37a   : > { %v1474_v27 = vmax.f32 %v1364_v26, 0.0 }
 0x37c   : > { %2443 = vmatprep.mubr.f32.mxu1 %v1474_v27  ;;  %v1741_v27 = vlaneseq }
 0x37d   : > { %2444 = vmatmul.mubr.f32.gmra.mrb[44].mxu1 %v1475_v28 }
 0x37e   : > { %v2368_v29 = vpop.f32.mrb[46].mxu0 }
 0x37f   : > { %v1379_v30 = vadd.f32 %v2368_v29, %v3015_v50  ;;  %v1373_v31 = vpop.f32.mrb[47].mxu0 }
 0x380   : > { %v1374_v32 = vadd.f32 %v3015_v50, %v1373_v31 }
 0x381   : > { %v1477_v34 = vmax.f32 %v1379_v30, 0.0 }
 0x382   : > { %v1476_v33 = vmax.f32 %v1374_v32, 0.0 }
 0x384   : > { %2446 = vmatprep.mubr.f32.mxu1 %v1476_v33 }
 0x385   : > { %2447 = vmatmul.mubr.f32.gmra.mrb[46].mxu1 %v1477_v34 }
 0x386   : > { %v2371_v35 = vpop.f32.mrb[48].mxu0 }
 0x387   : > { %v1389_v36 = vadd.f32 %v2371_v35, %v3015_v50  ;;  %v1383_v37 = vpop.f32.mrb[49].mxu0 }
 0x388   : > { %v1384_v38 = vadd.f32 %v3015_v50, %v1383_v37 }
 0x389   : > { %v1479_v40 = vmax.f32 %v1389_v36, 0.0 }
 0x38a   : > { %v1478_v39 = vmax.f32 %v1384_v38, 0.0 }
 0x38c   : > { %2449 = vmatprep.mubr.f32.mxu1 %v1478_v39 }
 0x38d   : > { %2450 = vmatmul.mubr.f32.gmra.mrb[48].mxu1 %v1479_v40 }
 0x38e   : > { %v2374_v41 = vpop.f32.mrb[50].mxu0 }
 0x38f   : > { %v1399_v42 = vadd.f32 %v2374_v41, %v3015_v50  ;;  %v1393_v43 = vpop.f32.mrb[51].mxu0 }
 0x390   : > { %v1394_v44 = vadd.f32 %v3015_v50, %v1393_v43 }
 0x391   : > { %v1481_v46 = vmax.f32 %v1399_v42, 0.0 }
 0x392   : > { %v1480_v45 = vmax.f32 %v1394_v44, 0.0 }
 0x394   : > { %2452 = vmatprep.mubr.f32.mxu1 %v1480_v45 }
 0x395   : > { %2453 = vmatmul.mubr.f32.gmra.mrb[50].mxu1 %v1481_v46 }
 0x396   : > { %v2377_v47 = vpop.f32.mrb[52].mxu0 }
 0x397   : > { %v1409_v48 = vadd.f32 %v2377_v47, %v3015_v50  ;;  %v1403_v49 = vpop.f32.mrb[53].mxu0 }
 0x398   : > { %v1404_v51 = vadd.f32 %v3015_v50, %v1403_v49 }
 0x399   : > { %v1483_v53 = vmax.f32 %v1409_v48, 0.0 }
 0x39a   : > { %v1482_v52 = vmax.f32 %v1404_v51, 0.0 }
 0x39c   : > { %2455 = vmatprep.mubr.f32.mxu1 %v1482_v52 }
 0x39d   : > { %2456 = vmatmul.mubr.f32.gmra.mrb[52].mxu1 %v1483_v53 }
 0x39e   : > { %v2380_v54 = vpop.f32.mrb[54].mxu0 }
 0x39f   : > { %v1419_v55 = vadd.f32 %v2380_v54, %v3015_v50  ;;  %v1413_v57 = vpop.f32.mrb[55].mxu0 }
 0x3a0   : > { %v1414_v58 = vadd.f32 %v3015_v50, %v1413_v57 }
 0x3a1   : > { %v1485_v56 = vmax.f32 %v1419_v55, 0.0 }
 0x3a2   : > { %v1484_v59 = vmax.f32 %v1414_v58, 0.0 }
 0x3a4   : > { %2458 = vmatprep.mubr.f32.mxu1 %v1484_v59 }
 0x3a5   : > { %2459 = vmatmul.mubr.f32.gmra.mrb[54].mxu1 %v1485_v56 }
 0x3a6   : > { %v2383_v62 = vpop.f32.mrb[56].mxu0 }
 0x3a7   : > { %v1429_v63 = vadd.f32 %v2383_v62, %v3015_v50  ;;  %v1423_v1 = vpop.f32.mrb[57].mxu0 }
 0x3a8   : > { %v1424_v2 = vadd.f32 %v3015_v50, %v1423_v1 }
 0x3a9   : > { %v1487_v5 = vmax.f32 %v1429_v63, 0.0 }
 0x3aa   : > { %v1486_v3 = vmax.f32 %v1424_v2, 0.0 }
 0x3ac   : > { %2461 = vmatprep.mubr.f32.mxu1 %v1486_v3 }
 0x3ad   : > { %2462 = vmatmul.mubr.f32.gmra.mrb[56].mxu1 %v1487_v5 }
 0x3ae   : > { %v2386_v61 = vpop.f32.mrb[58].mxu0 }
 0x3af   : > { %v1439_v6 = vadd.f32 %v2386_v61, %v3015_v50  ;;  %v1433_v0 = vpop.f32.mrb[59].mxu0 }
 0x3b0   : > { %v1434_v60 = vadd.f32 %v3015_v50, %v1433_v0 }
 0x3b1   : > { %v1489_v8 = vmax.f32 %v1439_v6, 0.0 }
 0x3b2   : > { %v1488_v7 = vmax.f32 %v1434_v60, 0.0 }
 0x3b4   : > { %2464 = vmatprep.mubr.f32.mxu1 %v1488_v7 }
 0x3b5   : > { %2465 = vmatmul.mubr.f32.gmra.mrb[58].mxu1 %v1489_v8 }
 0x3b6   : > { %v2389_v9 = vpop.f32.mrb[60].mxu0 }
 0x3b7   : > { %v1449_v10 = vadd.f32 %v2389_v9, %v3015_v50  ;;  %v1443_v11 = vpop.f32.mrb[61].mxu0 }
 0x3b8   : > { %v1444_v4 = vadd.f32 %v3015_v50, %v1443_v11 }
 0x3b9   : > { %v1491_v13 = vmax.f32 %v1449_v10, 0.0 }
 0x3ba   : > { %v1490_v12 = vmax.f32 %v1444_v4, 0.0 }
 0x3bc   : > { %2467 = vmatprep.mubr.f32.mxu1 %v1490_v12 }
 0x3bd   : > { %2468 = vmatmul.mubr.f32.gmra.mrb[60].mxu1 %v1491_v13 }
 0x3be   : > { %v2392_v14 = vpop.f32.mrb[62].mxu0 }
 0x3bf   : > { %v1459_v15 = vadd.f32 %v2392_v14, %v3015_v50  ;;  %v1453_v16 = vpop.f32.mrb[63].mxu0 }
 0x3c0   : > { %v1454_v17 = vadd.f32 %v3015_v50, %v1453_v16  ;;  %v3053_v50 = vand.u32 127, %v1741_v27 }
 0x3c1   : > { %v1493_v19 = vmax.f32 %v1459_v15, 0.0 }
 0x3c2   : > { %v1492_v18 = vmax.f32 %v1454_v17, 0.0  ;;  %vm1743_vm0 = vcmp.eq.s32.totalorder %v3053_v50, 1 }
 0x3c4   : > { %2470 = vmatprep.mubr.f32.mxu1 %v1492_v18 }
 0x3c5   : > { %2471 = vmatmul.mubr.f32.gmra.mrb[62].mxu1 %v1493_v19 }
 0x420   : > { %v2427_v21 = vpop.f32.mrb[32].mxu1 }
 0x421   : > { %v1588_v22 = vadd.f32 %v2427_v21, %v3049_v20  ;;  %v1582_v23 = vpop.f32.mrb[33].mxu1 }
 0x422   : > { %v1583_v24 = vadd.f32 %v3049_v20, %v1582_v23 }
 0x423   : > { %v1746_v25 = vmul.f32 1.442695, %v1588_v22 }
 0x424   : > { %v1744_v26 = vmul.f32 1.442695, %v1583_v24 }
 0x425   : > { %2629 = vpow2.f32 %v1746_v25 }
 0x426   : > { %2631 = vpow2.f32 %v1744_v26 }
 0x428   : > { %v2430_v28 = vpop.f32.mrb[34].mxu1 }
 0x429   : > { %v1598_v29 = vadd.f32 %v2430_v28, %v3049_v20  ;;  %v1592_v30 = vpop.f32.mrb[35].mxu1 }
 0x42a   : > { %v1593_v31 = vadd.f32 %v3049_v20, %v1592_v30 }
 0x42b   : > { %v1750_v32 = vmul.f32 1.442695, %v1598_v29 }
 0x42c   : > { %v1748_v33 = vmul.f32 1.442695, %v1593_v31 }
 0x42d   : > { %2633 = vpow2.f32 %v1750_v32 }
 0x42e   : > { %2635 = vpow2.f32 %v1748_v33 }
 0x42f   : > { %v2630_v34 = vpop.eup %2629 }
 0x430   : > { %v2632_v35 = vpop.eup %2631  ;;  %v1809_v36 = vsel %vm1743_vm0, %v2630_v34, %v1588_v22  ;;  %v2433_v37 = vpop.f32.mrb[36].mxu1 }
 0x431   : > { %1842 = vst.msk [vmem:[%s3063_s7 + $0x8] sm:$0xff] %vm1840_vm1, %v1809_v36  ;;  %v1808_v38 = vsel %vm1743_vm0, %v2632_v35, %v1583_v24  ;;  %v1608_v39 = vadd.f32 %v2433_v37, %v3049_v20  ;;  %v1602_v40 = vpop.f32.mrb[37].mxu1 }
 0x432   : > { %1841 = vst.msk [vmem:[%s3063_s7] sm:$0xff] %vm1840_vm1, %v1808_v38  ;;  %v1603_v41 = vadd.f32 %v3049_v20, %v1602_v40 }
 0x433   : > { %v1754_v42 = vmul.f32 1.442695, %v1608_v39 }
 0x434   : > { %v1752_v43 = vmul.f32 1.442695, %v1603_v41 }
 0x435   : > { %2637 = vpow2.f32 %v1754_v42 }
 0x436   : > { %2639 = vpow2.f32 %v1752_v43 }
 0x437   : > { %v2634_v44 = vpop.eup %2633 }
 0x438   : > { %v2636_v45 = vpop.eup %2635  ;;  %v1811_v46 = vsel %vm1743_vm0, %v2634_v44, %v1598_v29  ;;  %v2436_v47 = vpop.f32.mrb[38].mxu1 }
 0x439   : > { %1844 = vst.msk [vmem:[%s3063_s7 + $0x18] sm:$0xff] %vm1840_vm1, %v1811_v46  ;;  %v1810_v48 = vsel %vm1743_vm0, %v2636_v45, %v1593_v31  ;;  %v1618_v49 = vadd.f32 %v2436_v47, %v3049_v20  ;;  %v1612_v51 = vpop.f32.mrb[39].mxu1 }
 0x43a   : > { %1843 = vst.msk [vmem:[%s3063_s7 + $0x10] sm:$0xff] %vm1840_vm1, %v1810_v48  ;;  %v1613_v52 = vadd.f32 %v3049_v20, %v1612_v51 }
 0x43b   : > { %v1758_v53 = vmul.f32 1.442695, %v1618_v49 }
 0x43c   : > { %v1756_v54 = vmul.f32 1.442695, %v1613_v52 }
 0x43d   : > { %2641 = vpow2.f32 %v1758_v53 }
 0x43e   : > { %2643 = vpow2.f32 %v1756_v54 }
 0x43f   : > { %v2638_v55 = vpop.eup %2637 }
 0x440   : > { %v2640_v57 = vpop.eup %2639  ;;  %v1813_v58 = vsel %vm1743_vm0, %v2638_v55, %v1608_v39  ;;  %v2439_v59 = vpop.f32.mrb[40].mxu1 }
 0x441   : > { %1846 = vst.msk [vmem:[%s3063_s7 + $0x28] sm:$0xff] %vm1840_vm1, %v1813_v58  ;;  %v1812_v56 = vsel %vm1743_vm0, %v2640_v57, %v1603_v41  ;;  %v1628_v62 = vadd.f32 %v2439_v59, %v3049_v20  ;;  %v1622_v63 = vpop.f32.mrb[41].mxu1 }
 0x442   : > { %1845 = vst.msk [vmem:[%s3063_s7 + $0x20] sm:$0xff] %vm1840_vm1, %v1812_v56  ;;  %v1623_v1 = vadd.f32 %v3049_v20, %v1622_v63 }
 0x443   : > { %v1762_v2 = vmul.f32 1.442695, %v1628_v62 }
 0x444   : > { %v1760_v3 = vmul.f32 1.442695, %v1623_v1 }
 0x445   : > { %2645 = vpow2.f32 %v1762_v2 }
 0x446   : > { %2647 = vpow2.f32 %v1760_v3 }
 0x447   : > { %v2642_v5 = vpop.eup %2641 }
 0x448   : > { %v2644_v61 = vpop.eup %2643  ;;  %v1815_v6 = vsel %vm1743_vm0, %v2642_v5, %v1618_v49  ;;  %v2442_v0 = vpop.f32.mrb[42].mxu1 }
 0x449   : > { %1848 = vst.msk [vmem:[%s3063_s7 + $0x38] sm:$0xff] %vm1840_vm1, %v1815_v6  ;;  %v1814_v60 = vsel %vm1743_vm0, %v2644_v61, %v1613_v52  ;;  %v1638_v7 = vadd.f32 %v2442_v0, %v3049_v20  ;;  %v1632_v8 = vpop.f32.mrb[43].mxu1 }
 0x44a   : > { %1847 = vst.msk [vmem:[%s3063_s7 + $0x30] sm:$0xff] %vm1840_vm1, %v1814_v60  ;;  %v1633_v9 = vadd.f32 %v3049_v20, %v1632_v8 }
 0x44b   : > { %v1766_v10 = vmul.f32 1.442695, %v1638_v7 }
 0x44c   : > { %v1764_v11 = vmul.f32 1.442695, %v1633_v9 }
 0x44d   : > { %2649 = vpow2.f32 %v1766_v10 }
 0x44e   : > { %2651 = vpow2.f32 %v1764_v11 }
 0x44f   : > { %v2646_v4 = vpop.eup %2645 }
 0x450   : > { %v2648_v12 = vpop.eup %2647  ;;  %v1817_v13 = vsel %vm1743_vm0, %v2646_v4, %v1628_v62  ;;  %v2445_v14 = vpop.f32.mrb[44].mxu1 }
 0x451   : > { %1850 = vst.msk [vmem:[%s3063_s7 + $0x48] sm:$0xff] %vm1840_vm1, %v1817_v13  ;;  %v1816_v15 = vsel %vm1743_vm0, %v2648_v12, %v1623_v1  ;;  %v1648_v16 = vadd.f32 %v2445_v14, %v3049_v20  ;;  %v1642_v17 = vpop.f32.mrb[45].mxu1 }
 0x452   : > { %1849 = vst.msk [vmem:[%s3063_s7 + $0x40] sm:$0xff] %vm1840_vm1, %v1816_v15  ;;  %v1643_v18 = vadd.f32 %v3049_v20, %v1642_v17 }
 0x453   : > { %v1770_v19 = vmul.f32 1.442695, %v1648_v16 }
 0x454   : > { %v1768_v21 = vmul.f32 1.442695, %v1643_v18 }
 0x455   : > { %2653 = vpow2.f32 %v1770_v19 }
 0x456   : > { %2655 = vpow2.f32 %v1768_v21 }
 0x457   : > { %v2650_v22 = vpop.eup %2649 }
 0x458   : > { %v2652_v23 = vpop.eup %2651  ;;  %v1819_v24 = vsel %vm1743_vm0, %v2650_v22, %v1638_v7  ;;  %v2448_v25 = vpop.f32.mrb[46].mxu1 }
 0x459   : > { %1852 = vst.msk [vmem:[%s3063_s7 + $0x58] sm:$0xff] %vm1840_vm1, %v1819_v24  ;;  %v1818_v26 = vsel %vm1743_vm0, %v2652_v23, %v1633_v9  ;;  %v1658_v27 = vadd.f32 %v2448_v25, %v3049_v20  ;;  %v1652_v28 = vpop.f32.mrb[47].mxu1 }
 0x45a   : > { %1851 = vst.msk [vmem:[%s3063_s7 + $0x50] sm:$0xff] %vm1840_vm1, %v1818_v26  ;;  %v1653_v29 = vadd.f32 %v3049_v20, %v1652_v28 }
 0x45b   : > { %v1774_v30 = vmul.f32 1.442695, %v1658_v27 }
 0x45c   : > { %v1772_v31 = vmul.f32 1.442695, %v1653_v29 }
 0x45d   : > { %2657 = vpow2.f32 %v1774_v30 }
 0x45e   : > { %2659 = vpow2.f32 %v1772_v31 }
 0x45f   : > { %v2654_v32 = vpop.eup %2653 }
 0x460   : > { %v2656_v33 = vpop.eup %2655  ;;  %v1821_v34 = vsel %vm1743_vm0, %v2654_v32, %v1648_v16  ;;  %v2451_v35 = vpop.f32.mrb[48].mxu1 }
 0x461   : > { %1854 = vst.msk [vmem:[%s3063_s7 + $0x68] sm:$0xff] %vm1840_vm1, %v1821_v34  ;;  %v1820_v36 = vsel %vm1743_vm0, %v2656_v33, %v1643_v18  ;;  %v1668_v37 = vadd.f32 %v2451_v35, %v3049_v20  ;;  %v1662_v38 = vpop.f32.mrb[49].mxu1 }
 0x462   : > { %1853 = vst.msk [vmem:[%s3063_s7 + $0x60] sm:$0xff] %vm1840_vm1, %v1820_v36  ;;  %v1663_v39 = vadd.f32 %v3049_v20, %v1662_v38 }
 0x463   : > { %v1778_v40 = vmul.f32 1.442695, %v1668_v37 }
 0x464   : > { %v1776_v41 = vmul.f32 1.442695, %v1663_v39 }
 0x465   : > { %2661 = vpow2.f32 %v1778_v40 }
 0x466   : > { %2663 = vpow2.f32 %v1776_v41 }
 0x467   : > { %v2658_v42 = vpop.eup %2657 }
 0x468   : > { %v2660_v43 = vpop.eup %2659  ;;  %v1823_v44 = vsel %vm1743_vm0, %v2658_v42, %v1658_v27  ;;  %v2454_v45 = vpop.f32.mrb[50].mxu1 }
 0x469   : > { %1856 = vst.msk [vmem:[%s3063_s7 + $0x78] sm:$0xff] %vm1840_vm1, %v1823_v44  ;;  %v1822_v46 = vsel %vm1743_vm0, %v2660_v43, %v1653_v29  ;;  %v1678_v47 = vadd.f32 %v2454_v45, %v3049_v20  ;;  %v1672_v48 = vpop.f32.mrb[51].mxu1 }
 0x46a   : > { %1855 = vst.msk [vmem:[%s3063_s7 + $0x70] sm:$0xff] %vm1840_vm1, %v1822_v46  ;;  %v1673_v49 = vadd.f32 %v3049_v20, %v1672_v48 }
 0x46b   : > { %v1782_v51 = vmul.f32 1.442695, %v1678_v47 }
 0x46c   : > { %v1780_v52 = vmul.f32 1.442695, %v1673_v49 }
 0x46d   : > { %2665 = vpow2.f32 %v1782_v51 }
 0x46e   : > { %2667 = vpow2.f32 %v1780_v52 }
 0x46f   : > { %v2662_v53 = vpop.eup %2661 }
 0x470   : > { %v2664_v54 = vpop.eup %2663  ;;  %v1825_v55 = vsel %vm1743_vm0, %v2662_v53, %v1668_v37  ;;  %v2457_v57 = vpop.f32.mrb[52].mxu1 }
 0x471   : > { %1858 = vst.msk [vmem:[%s3063_s7 + $0x88] sm:$0xff] %vm1840_vm1, %v1825_v55  ;;  %v1824_v58 = vsel %vm1743_vm0, %v2664_v54, %v1663_v39  ;;  %v1688_v59 = vadd.f32 %v2457_v57, %v3049_v20  ;;  %v1682_v56 = vpop.f32.mrb[53].mxu1 }
 0x472   : > { %1857 = vst.msk [vmem:[%s3063_s7 + $0x80] sm:$0xff] %vm1840_vm1, %v1824_v58  ;;  %v1683_v62 = vadd.f32 %v3049_v20, %v1682_v56 }
 0x473   : > { %v1786_v63 = vmul.f32 1.442695, %v1688_v59 }
 0x474   : > { %v1784_v1 = vmul.f32 1.442695, %v1683_v62 }
 0x475   : > { %2669 = vpow2.f32 %v1786_v63 }
 0x476   : > { %2671 = vpow2.f32 %v1784_v1 }
 0x477   : > { %v2666_v2 = vpop.eup %2665 }
 0x478   : > { %v2668_v3 = vpop.eup %2667  ;;  %v1827_v5 = vsel %vm1743_vm0, %v2666_v2, %v1678_v47  ;;  %v2460_v61 = vpop.f32.mrb[54].mxu1 }
 0x479   : > { %1860 = vst.msk [vmem:[%s3063_s7 + $0x98] sm:$0xff] %vm1840_vm1, %v1827_v5  ;;  %v1826_v6 = vsel %vm1743_vm0, %v2668_v3, %v1673_v49  ;;  %v1698_v0 = vadd.f32 %v2460_v61, %v3049_v20  ;;  %v1692_v60 = vpop.f32.mrb[55].mxu1 }
 0x47a   : > { %1859 = vst.msk [vmem:[%s3063_s7 + $0x90] sm:$0xff] %vm1840_vm1, %v1826_v6  ;;  %v1693_v7 = vadd.f32 %v3049_v20, %v1692_v60 }
 0x47b   : > { %v1790_v8 = vmul.f32 1.442695, %v1698_v0 }
 0x47c   : > { %v1788_v9 = vmul.f32 1.442695, %v1693_v7 }
 0x47d   : > { %2673 = vpow2.f32 %v1790_v8 }
 0x47e   : > { %2675 = vpow2.f32 %v1788_v9 }
 0x47f   : > { %v2670_v10 = vpop.eup %2669 }
 0x480   : > { %v2672_v11 = vpop.eup %2671  ;;  %v1829_v4 = vsel %vm1743_vm0, %v2670_v10, %v1688_v59  ;;  %v2463_v12 = vpop.f32.mrb[56].mxu1 }
 0x481   : > { %1862 = vst.msk [vmem:[%s3063_s7 + $0xa8] sm:$0xff] %vm1840_vm1, %v1829_v4  ;;  %v1828_v13 = vsel %vm1743_vm0, %v2672_v11, %v1683_v62  ;;  %v1708_v14 = vadd.f32 %v2463_v12, %v3049_v20  ;;  %v1702_v15 = vpop.f32.mrb[57].mxu1 }
 0x482   : > { %1861 = vst.msk [vmem:[%s3063_s7 + $0xa0] sm:$0xff] %vm1840_vm1, %v1828_v13  ;;  %v1703_v16 = vadd.f32 %v3049_v20, %v1702_v15 }
 0x483   : > { %v1794_v17 = vmul.f32 1.442695, %v1708_v14 }
 0x484   : > { %v1792_v18 = vmul.f32 1.442695, %v1703_v16 }
 0x485   : > { %2677 = vpow2.f32 %v1794_v17 }
 0x486   : > { %2679 = vpow2.f32 %v1792_v18 }
 0x487   : > { %v2674_v19 = vpop.eup %2673 }
 0x488   : > { %v2676_v21 = vpop.eup %2675  ;;  %v1831_v22 = vsel %vm1743_vm0, %v2674_v19, %v1698_v0  ;;  %v2466_v23 = vpop.f32.mrb[58].mxu1 }
 0x489   : > { %1864 = vst.msk [vmem:[%s3063_s7 + $0xb8] sm:$0xff] %vm1840_vm1, %v1831_v22  ;;  %v1830_v24 = vsel %vm1743_vm0, %v2676_v21, %v1693_v7  ;;  %v1718_v25 = vadd.f32 %v2466_v23, %v3049_v20  ;;  %v1712_v26 = vpop.f32.mrb[59].mxu1 }
 0x48a   : > { %1863 = vst.msk [vmem:[%s3063_s7 + $0xb0] sm:$0xff] %vm1840_vm1, %v1830_v24  ;;  %v1713_v27 = vadd.f32 %v3049_v20, %v1712_v26 }
 0x48b   : > { %v1798_v28 = vmul.f32 1.442695, %v1718_v25 }
 0x48c   : > { %v1796_v29 = vmul.f32 1.442695, %v1713_v27 }
 0x48d   : > { %2681 = vpow2.f32 %v1798_v28 }
 0x48e   : > { %2683 = vpow2.f32 %v1796_v29 }
 0x48f   : > { %v2678_v30 = vpop.eup %2677 }
 0x490   : > { %v2680_v31 = vpop.eup %2679  ;;  %v1833_v32 = vsel %vm1743_vm0, %v2678_v30, %v1708_v14  ;;  %v2469_v33 = vpop.f32.mrb[60].mxu1 }
 0x491   : > { %1866 = vst.msk [vmem:[%s3063_s7 + $0xc8] sm:$0xff] %vm1840_vm1, %v1833_v32  ;;  %v1832_v34 = vsel %vm1743_vm0, %v2680_v31, %v1703_v16  ;;  %v1728_v35 = vadd.f32 %v2469_v33, %v3049_v20  ;;  %v1722_v36 = vpop.f32.mrb[61].mxu1 }
 0x492   : > { %1865 = vst.msk [vmem:[%s3063_s7 + $0xc0] sm:$0xff] %vm1840_vm1, %v1832_v34  ;;  %v1723_v37 = vadd.f32 %v3049_v20, %v1722_v36 }
 0x493   : > { %v1802_v38 = vmul.f32 1.442695, %v1728_v35 }
 0x494   : > { %v1800_v39 = vmul.f32 1.442695, %v1723_v37 }
 0x495   : > { %2685 = vpow2.f32 %v1802_v38 }
 0x496   : > { %2687 = vpow2.f32 %v1800_v39 }
 0x497   : > { %v2682_v40 = vpop.eup %2681 }
 0x498   : > { %v2684_v41 = vpop.eup %2683  ;;  %v1835_v42 = vsel %vm1743_vm0, %v2682_v40, %v1718_v25  ;;  %v2472_v43 = vpop.f32.mrb[62].mxu1 }
 0x499   : > { %1868 = vst.msk [vmem:[%s3063_s7 + $0xd8] sm:$0xff] %vm1840_vm1, %v1835_v42  ;;  %v1834_v44 = vsel %vm1743_vm0, %v2684_v41, %v1713_v27  ;;  %v1738_v45 = vadd.f32 %v2472_v43, %v3049_v20  ;;  %v1732_v46 = vpop.f32.mrb[63].mxu1 }
 0x49a   : > { %1867 = vst.msk [vmem:[%s3063_s7 + $0xd0] sm:$0xff] %vm1840_vm1, %v1834_v44  ;;  %v1733_v47 = vadd.f32 %v3049_v20, %v1732_v46 }
 0x49b   : > { %v1806_v48 = vmul.f32 1.442695, %v1738_v45 }
 0x49c   : > { %v1804_v49 = vmul.f32 1.442695, %v1733_v47 }
 0x49d   : > { %2689 = vpow2.f32 %v1806_v48 }
 0x49e   : > { %2691 = vpow2.f32 %v1804_v49 }
 0x49f   : > { %v2686_v51 = vpop.eup %2685 }
 0x4a0   : > { %v2688_v52 = vpop.eup %2687  ;;  %v1837_v53 = vsel %vm1743_vm0, %v2686_v51, %v1728_v35 }
 0x4a1   : > { %1870 = vst.msk [vmem:[%s3063_s7 + $0xe8] sm:$0xff] %vm1840_vm1, %v1837_v53  ;;  %v1836_v54 = vsel %vm1743_vm0, %v2688_v52, %v1723_v37 }
 0x4a2   : > { %1869 = vst.msk [vmem:[%s3063_s7 + $0xe0] sm:$0xff] %vm1840_vm1, %v1836_v54 }
 0x4a7   : > { %v2690_v55 = vpop.eup %2689 }
 0x4a8   : > { %v2692_v57 = vpop.eup %2691  ;;  %v1839_v20 = vsel %vm1743_vm0, %v2690_v55, %v1738_v45 }
 0x4a9   : > { %1872 = vst.msk [vmem:[%s3063_s7 + $0xf8] sm:$0xff] %vm1840_vm1, %v1839_v20  ;;  %v1838_v58 = vsel %vm1743_vm0, %v2692_v57, %v1733_v47 }
 0x4aa   : > { %1871 = vst.msk [vmem:[%s3063_s7 + $0xf0] sm:$0xff] %vm1840_vm1, %v1838_v58 }
 0x4ab PF: > { %s13_s9 = sadd.s32 1, %s2731_s9  }
 0x4ac   : > { %p10_p3 = scmp.ge.s32.totalorder %s13_s9, 4  }
 0x4ae   :  { %12 = sbr.rel (!%p10_p3) target bundleno = 1 (0x1), region = 67 }
 0x4b5   :  { %1895 = vsyncpa [#allocation3], 1 }
 0x4b6   :  { %1897 = vsyncpa [#allocation3 + $0x1], 1 }

</bundles_post_ra>
